<compile_context>
chip_gen: v7x
topology: tpu7x:2x2x1
jax: 0.10.0
libtpu: 0.0.40
codegen_flags: <defaults>
</compile_context>

<pallas_src>
import math

import jax
import jax.numpy as jnp
from jax.experimental import pallas as pl
from jax.experimental.pallas import tpu as pltpu

IN_FEATURES = 2400      # skip-thoughts sentence-vector size (fixed by the module: Linear in_features=2400)
EMBED_DIM = 512         # opt['embed']['embed_dim'] (lane-dense: multiple of 128)
BATCH = 2


def skipthoughts_embed_kernel(x_ref, w_ref, b_ref, o_ref):
    # out = relu(x @ W + b) — single fused grid-less step, all operands VMEM-resident.
    # Weight arrives as bf16 (halves the dominant HBM->VMEM DMA); upcast in-kernel and
    # accumulate in f32 on the MXU.
    w = w_ref[...].astype(jnp.float32)                                        # (K, N) bf16 -> f32 (VPU, cheap)
    y = jnp.dot(x_ref[...], w, preferred_element_type=jnp.float32)           # (B, N) MXU matmul, f32 acc
    y = y + b_ref[...]                                                        # bias broadcast (1, N)
    o_ref[...] = jnp.maximum(y, 0.0).astype(o_ref.dtype)                      # ReLU, full lane-dense store
    # TODO(synk): the out_dropout >= 0 path (F.dropout with training=True) would need
    # pltpu.prng_seed / pltpu.prng_random_bits masking; the constructor default (-1) skips it.


def prepare_params(weight, bias, *, weight_dtype=jnp.bfloat16):
    """One-time parameter prep (call at init, NOT per forward step).

    weight: PyTorch nn.Linear layout (embed_dim, 2400).
    bias:   (embed_dim,).
    Returns (w_t, b2d): w_t is (2400, embed_dim) in `weight_dtype` (bf16 by default — portable
    across v5e/v6e/v7x; int8 on v5e/v6e or fp8 on v7x would need per-channel scales),
    b2d is (1, embed_dim) f32.
    """
    N, K = weight.shape
    w_t = jnp.asarray(weight, jnp.float32).T.astype(weight_dtype)   # (K, N)
    b2d = jnp.asarray(bias, jnp.float32).reshape(1, N)              # (1, N)
    return w_t, b2d


def skipthoughts_embedding_forward(x_t_vec, w_t, b2d, out_dropout=-1.0):
    """x_t_vec: (B, 2400) f32 seq2vec output.
    w_t: (2400, N) pre-transposed weight (bf16) from prepare_params.
    b2d: (1, N) f32 bias from prepare_params."""
    if out_dropout >= 0:
        # TODO(synk): dropout path not implemented in the kernel; the module default (-1) skips it.
        raise NotImplementedError("out_dropout >= 0 path is not implemented in the Pallas kernel")

    B, K = x_t_vec.shape
    K2, N = w_t.shape
    assert K2 == K and b2d.shape == (1, N)

    vmem = pl.BlockSpec(memory_space=pltpu.MemorySpace.VMEM)   # whole array, VMEM-resident, no grid

    bytes_accessed = (x_t_vec.size * x_t_vec.dtype.itemsize
                      + w_t.size * w_t.dtype.itemsize
                      + b2d.size * b2d.dtype.itemsize
                      + B * N * jnp.dtype(x_t_vec.dtype).itemsize)

    return pl.pallas_call(
        skipthoughts_embed_kernel,
        out_shape=jax.ShapeDtypeStruct((B, N), x_t_vec.dtype),
        in_specs=[vmem, vmem, vmem],
        out_specs=vmem,
        cost_estimate=pl.CostEstimate(flops=2 * B * K * N,
                                      bytes_accessed=bytes_accessed,
                                      transcendentals=0),
    )(x_t_vec, w_t, b2d)


def skipthoughts_embedding_reference(x_t_vec, w_t, b2d):
    # Pure-JAX reference on the SAME (bf16-stored) weight: relu(x @ W + b); dropout skipped.
    w = w_t.astype(jnp.float32)
    y = jnp.dot(x_t_vec, w, preferred_element_type=jnp.float32,
                precision=jax.lax.Precision.HIGHEST)
    return jnp.maximum(y + b2d, 0.0)


if __name__ == "__main__":
    key = jax.random.PRNGKey(0)
    kx, kw, kb = jax.random.split(key, 3)

    # TODO(synk): seq2vec (pretrained skip-thoughts GRU sentence encoder over token ids) has no
    # clean Pallas equivalent without the pretrained model; use its 2400-d output as kernel input.
    x_t_vec = jax.random.normal(kx, (BATCH, IN_FEATURES), jnp.float32)

    # nn.Linear(2400, EMBED_DIM) default init: U(-1/sqrt(fan_in), 1/sqrt(fan_in)).
    bound = 1.0 / math.sqrt(IN_FEATURES)
    weight = jax.random.uniform(kw, (EMBED_DIM, IN_FEATURES), jnp.float32, -bound, bound)
    bias = jax.random.uniform(kb, (EMBED_DIM,), jnp.float32, -bound, bound)

    # Init-time prep (transpose + bf16 cast + bias reshape), OFF the per-step hot path.
    w_t, b2d = prepare_params(weight, bias)
    w_t, b2d = jax.block_until_ready((w_t, b2d))

    out = skipthoughts_embedding_forward(x_t_vec, w_t, b2d)
    out = jax.block_until_ready(out)

    ref = skipthoughts_embedding_reference(x_t_vec, w_t, b2d)
    assert out.shape == (BATCH, EMBED_DIM)
    max_err = float(jnp.max(jnp.abs(out - ref)))
    # Tolerance covers MXU f32 pass-decomposition / accumulation-order differences over K=2400
    # (weight quantization to bf16 is identical in kernel and reference, so it cancels).
    assert max_err < 1e-2, f"mismatch vs reference: max abs err {max_err}"
    print("KERNEL_OK")
</pallas_src>

<mosaic_0001>
module attributes {stable_mosaic.version = 11 : i64} {
  func.func @skipthoughts_embed_kernel(%arg0: memref<2x2400xf32, #tpu.memory_space<vmem>>, %arg1: memref<2400x512xbf16, #tpu.memory_space<vmem>>, %arg2: memref<1x512xf32, #tpu.memory_space<vmem>>, %arg3: memref<2x512xf32, #tpu.memory_space<vmem>>) attributes {dimension_semantics = [], scalar_prefetch = 0 : i64, scratch_operands = 0 : i64, tpu.core_type = #tpu.core_type<tc>} {
    %c0 = arith.constant 0 : index
    %c0_0 = arith.constant 0 : index
    %0 = vector.load %arg1[%c0, %c0_0] : memref<2400x512xbf16, #tpu.memory_space<vmem>>, vector<2400x512xbf16>
    %1 = arith.extf %0 : vector<2400x512xbf16> to vector<2400x512xf32>
    %c0_1 = arith.constant 0 : index
    %c0_2 = arith.constant 0 : index
    %2 = vector.load %arg0[%c0_1, %c0_2] : memref<2x2400xf32, #tpu.memory_space<vmem>>, vector<2x2400xf32>
    %cst = arith.constant dense<0.000000e+00> : vector<2x512xf32>
    %3 = tpu.matmul %2, %1, %cst {dimension_numbers = #tpu.dot_dimension_numbers<[1], [0], [0], [1], [0, 0, 1, 1], [], []>} : vector<2x2400xf32>, vector<2400x512xf32>, vector<2x512xf32> -> vector<2x512xf32>
    %c0_3 = arith.constant 0 : index
    %c0_4 = arith.constant 0 : index
    %4 = vector.load %arg2[%c0_3, %c0_4] : memref<1x512xf32, #tpu.memory_space<vmem>>, vector<1x512xf32>
    %5 = vector.broadcast %4 : vector<1x512xf32> to vector<2x512xf32>
    %6 = arith.addf %3, %5 : vector<2x512xf32>
    %cst_5 = arith.constant 0.000000e+00 : f32
    %7 = vector.broadcast %cst_5 : f32 to vector<2x512xf32>
    %8 = arith.maximumf %6, %7 : vector<2x512xf32>
    %c0_6 = arith.constant 0 : index
    %c0_7 = arith.constant 0 : index
    %9 = vector.load %arg3[%c0_6, %c0_7] : memref<2x512xf32, #tpu.memory_space<vmem>>, vector<2x512xf32>
    tpu.vector_store %arg3[%c0_6, %c0_7], %8 {strides = array<i32>} : memref<2x512xf32, #tpu.memory_space<vmem>>, vector<2x512xf32>,
    return
  }
}

</mosaic_0001>

<bundles_post_ra>
// kernel: tpu_custom_call.1
= control target key start
LH: loop header
LB: loop body
LE: loop exit
PB: predicated region body
PF: predicated region fallthrough
CT: control target
= control target key end

     0   :  { %8 = vsyncpa [#allocation3], 0  ;;  %s6466_s0 = inlined_call_operand.hbm [shape: f32[2,2400], index: 0, kind: input, shape index: {}]   ;;  %s6467_s1 = inlined_call_operand.hbm [shape: bf16[2400,512], index: 1, kind: input, shape index: {}]   ;;  %s6468_s2 = inlined_call_operand.hbm [shape: f32[1,512], index: 2, kind: input, shape index: {}]   ;;  %s6469_s3 = inlined_call_operand.hbm [shape: f32[2,512], index: 3, kind: output, shape index: {}]  }
   0x1   :  { %9 = vsyncpa [#allocation6], 0 }
   0x2   :  { %10 = vsyncpa [#allocation4], 0  ;;  %s6301_s12 = smov [#allocation5]   ;;  %s6207_s16 = scalar_lea.hbm %s6467_s1, 76800 }
   0x3   :  { %s26_s13 = sshll.u32 %s6301_s12, 4  ;;  %p6208_p0 = scmp.ne.s32.totalorder %s6467_s1, %s6207_s16  ;;  %s27_s13 = int_to_ptr.vmem [resolvable:$true] %s26_s13 }
   0x4   :  { %p6211_p1 = scmp.lt.u32.totalorder %s6207_s16, %s6467_s1 }
   0x6   :  { %p6213_p2 = pnand %p6211_p1, %p6208_p0 }
   0x8   :  { %6216 = shalt.err (!%p6213_p2)
}
   0x9   :  { %s6217_s21 = scalar_lea.vmem %s27_s13, 76800  ;;  %p6222_p4 = scmp.lt.s32.totalorder %s27_s13, %s27_s13 }
   0xa   :  { %p6218_p3 = scmp.ne.s32.totalorder %s27_s13, %s6217_s21  ;;  %p6223_p5 = scmp.lt.s32.totalorder %s6217_s21, %s6217_s21 }
   0xc   :  { %p6224_p6 = por %p6223_p5, %p6222_p4 }
   0xe   :  { %p6225_p7 = pnand %p6224_p6, %p6218_p3 }
  0x10   :  { %6228 = shalt.err (!%p6225_p7)
}
  0x11   :  { %s6302_s22 = smov 256   ;;  %s6303_s23 = smov 16  }
  0x12   :  { %32 = dma.hbm_to_vmem [thread:$0]  %s6467_s1, 76800, %s27_s13, [#allocation6], %s6302_s22, %s6302_s22, %s6303_s23  }
  0x13   :  { %s6304_s26 = smov [#allocation2]   ;;  %s6305_s28 = smov [#allocation7]  }
  0x14   :  { %s17_s27 = sshll.u32 %s6304_s26, 4  ;;  %s39_s29 = sshll.u32 %s6305_s28, 4  ;;  %s18_s27 = int_to_ptr.vmem [resolvable:$true] %s17_s27  ;;  %s40_s29 = int_to_ptr.vmem [resolvable:$true] %s39_s29 }
  0x15   :  { %s6229_s5 = scalar_lea.hbm %s6466_s0, 608 }
  0x16   :  { %p6230_p8 = scmp.ne.s32.totalorder %s6466_s0, %s6229_s5  ;;  %p6233_p9 = scmp.lt.u32.totalorder %s6229_s5, %s6466_s0 }
  0x18   :  { %p6235_p10 = pnand %p6233_p9, %p6230_p8 }
  0x1a   :  { %6238 = shalt.err (!%p6235_p10)
}
  0x1b   :  { %s6239_s1 = scalar_lea.vmem %s18_s27, 608  ;;  %p6244_p12 = scmp.lt.s32.totalorder %s18_s27, %s18_s27 }
  0x1c   :  { %p6240_p11 = scmp.ne.s32.totalorder %s18_s27, %s6239_s1  ;;  %p6245_p13 = scmp.lt.s32.totalorder %s6239_s1, %s6239_s1 }
  0x1e   :  { %p6246_p0 = por %p6245_p13, %p6244_p12 }
  0x20   :  { %p6247_p1 = pnand %p6246_p0, %p6240_p11 }
  0x22   :  { %6250 = shalt.err (!%p6247_p1)
}
  0x23   :  { %20 = dma.hbm_to_vmem [thread:$0]  %s6466_s0, 608, %s18_s27, [#allocation3]  }
  0x24   :  { %s6251_s14 = scalar_lea.hbm %s6468_s2, 64 }
  0x25   :  { %p6252_p2 = scmp.ne.s32.totalorder %s6468_s2, %s6251_s14  ;;  %p6255_p3 = scmp.lt.u32.totalorder %s6251_s14, %s6468_s2 }
  0x27   :  { %p6257_p4 = pnand %p6255_p3, %p6252_p2 }
  0x29   :  { %6260 = shalt.err (!%p6257_p4)
}
  0x2a   :  { %s6261_s19 = scalar_lea.vmem %s40_s29, 64  ;;  %p6266_p6 = scmp.lt.s32.totalorder %s40_s29, %s40_s29 }
  0x2b   :  { %p6262_p5 = scmp.ne.s32.totalorder %s40_s29, %s6261_s19  ;;  %p6267_p7 = scmp.lt.s32.totalorder %s6261_s19, %s6261_s19 }
  0x2d   :  { %p6268_p8 = por %p6267_p7, %p6266_p6 }
  0x2f   :  { %p6269_p9 = pnand %p6268_p8, %p6262_p5 }
  0x31   :  { %6272 = shalt.err (!%p6269_p9)
}
  0x32   :  { %42 = dma.hbm_to_vmem [thread:$0]  %s6468_s2, 64, %s40_s29, [#allocation6]  }
  0x33   :  { %6295 = dma.done.wait [#allocation3], 608  }
  0x34   :  { %6296 = vsyncadd [#allocation3], 4294966688 }
  0x35   :  { %6297 = dma.done.wait [#allocation6], 76864  }
  0x36   :  { %6298 = vsyncadd [#allocation6], 4294890432  ;;  %v5302_v0 = vld [vmem:[#allocation5 + $0x4] ss:$16 sps:$4 sm:$0xff]   ;;  %v5304_v1 = vld [vmem:[#allocation5 + $0xc] ss:$16 sps:$4 sm:$0xff]   ;;  %v1859_v36 = vlaneseq }
  0x37   :  { %3455 = vmatprep.subr.bf16.mxu0 %v5302_v0  ;;  %v5306_v2 = vld [vmem:[#allocation5] ss:$16 sps:$4 sm:$0xff]   ;;  %v5307_v3 = vld [vmem:[#allocation5 + $0x8] ss:$16 sps:$4 sm:$0xff]   ;;  %4055 = vmatprep.subr.bf16.mxu1 %v5304_v1  ;;  %v5308_v4 = vld [vmem:[#allocation5 + $0x24] ss:$16 sps:$4 sm:$0xff]  }
  0x38   :  { %3457 = vmatpush1.bf16.msra.mxu0 %v5306_v2  ;;  %4057 = vmatpush1.bf16.msra.mxu1 %v5307_v3  ;;  %v5310_v5 = vld [vmem:[#allocation5 + $0x2c] ss:$16 sps:$4 sm:$0xff]   ;;  %v5312_v6 = vld [vmem:[#allocation5 + $0x20] ss:$16 sps:$4 sm:$0xff]   ;;  %v5313_v7 = vld [vmem:[#allocation5 + $0x28] ss:$16 sps:$4 sm:$0xff]  }
  0x39   :  { %3459 = vmatprep.subr.bf16.mxu0 %v5308_v4  ;;  %4059 = vmatprep.subr.bf16.mxu1 %v5310_v5  ;;  %v5314_v8 = vld [vmem:[#allocation5 + $0x44] ss:$16 sps:$4 sm:$0xff]   ;;  %v5316_v9 = vld [vmem:[#allocation5 + $0x4c] ss:$16 sps:$4 sm:$0xff]   ;;  %v5318_v10 = vld [vmem:[#allocation5 + $0x40] ss:$16 sps:$4 sm:$0xff]  }
  0x3a   :  { %v5319_v11 = vld [vmem:[#allocation5 + $0x48] ss:$16 sps:$4 sm:$0xff]   ;;  %v5320_v12 = vld [vmem:[#allocation5 + $0x64] ss:$16 sps:$4 sm:$0xff]   ;;  %v5322_v13 = vld [vmem:[#allocation5 + $0x6c] ss:$16 sps:$4 sm:$0xff]  }
  0x3b   :  { %v5324_v14 = vld [vmem:[#allocation5 + $0x60] ss:$16 sps:$4 sm:$0xff]   ;;  %v5325_v15 = vld [vmem:[#allocation5 + $0x68] ss:$16 sps:$4 sm:$0xff]   ;;  %v5326_v16 = vld [vmem:[#allocation5 + $0x84] ss:$16 sps:$4 sm:$0xff]  }
  0x3c   :  { %3461 = vmatpush1.bf16.msra.mxu0 %v5312_v6  ;;  %4061 = vmatpush1.bf16.msra.mxu1 %v5313_v7  ;;  %v5328_v17 = vld [vmem:[#allocation5 + $0x8c] ss:$16 sps:$4 sm:$0xff]   ;;  %v5330_v18 = vld [vmem:[#allocation5 + $0x80] ss:$16 sps:$4 sm:$0xff]   ;;  %v5331_v19 = vld [vmem:[#allocation5 + $0x88] ss:$16 sps:$4 sm:$0xff]  }
  0x3d   :  { %3463 = vmatprep.subr.bf16.mxu0 %v5314_v8  ;;  %4063 = vmatprep.subr.bf16.mxu1 %v5316_v9  ;;  %v5332_v20 = vld [vmem:[#allocation5 + $0xa4] ss:$16 sps:$4 sm:$0xff]   ;;  %v5334_v21 = vld [vmem:[#allocation5 + $0xac] ss:$16 sps:$4 sm:$0xff]   ;;  %v5336_v22 = vld [vmem:[#allocation5 + $0xa0] ss:$16 sps:$4 sm:$0xff]  }
  0x3e   :  { %v5337_v23 = vld [vmem:[#allocation5 + $0xa8] ss:$16 sps:$4 sm:$0xff]   ;;  %v5338_v24 = vld [vmem:[#allocation5 + $0xc4] ss:$16 sps:$4 sm:$0xff]   ;;  %v5340_v25 = vld [vmem:[#allocation5 + $0xcc] ss:$16 sps:$4 sm:$0xff]  }
  0x3f   :  { %v5342_v26 = vld [vmem:[#allocation5 + $0xc0] ss:$16 sps:$4 sm:$0xff]   ;;  %v5343_v27 = vld [vmem:[#allocation5 + $0xc8] ss:$16 sps:$4 sm:$0xff]   ;;  %v5344_v28 = vld [vmem:[#allocation5 + $0xe4] ss:$16 sps:$4 sm:$0xff]  }
  0x40   :  { %3465 = vmatpush1.bf16.msra.mxu0 %v5318_v10  ;;  %4065 = vmatpush1.bf16.msra.mxu1 %v5319_v11  ;;  %v5346_v29 = vld [vmem:[#allocation5 + $0xec] ss:$16 sps:$4 sm:$0xff]   ;;  %v5348_v30 = vld [vmem:[#allocation5 + $0xe0] ss:$16 sps:$4 sm:$0xff]   ;;  %v5349_v31 = vld [vmem:[#allocation5 + $0xe8] ss:$16 sps:$4 sm:$0xff]  }
  0x41   :  { %3467 = vmatprep.subr.bf16.mxu0 %v5320_v12  ;;  %4067 = vmatprep.subr.bf16.mxu1 %v5322_v13  ;;  %v5350_v32 = vld [vmem:[#allocation5 + $0x104] ss:$16 sps:$4 sm:$0xff]   ;;  %v5352_v33 = vld [vmem:[#allocation5 + $0x10c] ss:$16 sps:$4 sm:$0xff]   ;;  %v5354_v34 = vld [vmem:[#allocation5 + $0x100] ss:$16 sps:$4 sm:$0xff]  }
  0x42   :  { %v5355_v35 = vld [vmem:[#allocation5 + $0x108] ss:$16 sps:$4 sm:$0xff]   ;;  %v6306_v37 = vmov 1983009808   ;;  %v5356_v39 = vld [vmem:[#allocation5 + $0x124] ss:$16 sps:$4 sm:$0xff]  }
  0x43   :  { %v1886_v38 = vunpack.c.l.s4 %v6306_v37  ;;  %v5358_v40 = vld [vmem:[#allocation5 + $0x12c] ss:$16 sps:$4 sm:$0xff]   ;;  %v5360_v41 = vld [vmem:[#allocation5 + $0x120] ss:$16 sps:$4 sm:$0xff]   ;;  %v6365_v42 = vshrl.u32 %v1859_v36, 7  ;;  %vm1986_vm0 = vcmask 785408  }
  0x44   :  { %3469 = vmatpush1.bf16.msra.mxu0 %v5324_v14  ;;  %4069 = vmatpush1.bf16.msra.mxu1 %v5325_v15  ;;  %v5361_v44 = vld [vmem:[#allocation5 + $0x128] ss:$16 sps:$4 sm:$0xff]   ;;  %v5362_v45 = vld [vmem:[#allocation5 + $0x144] ss:$16 sps:$4 sm:$0xff]   ;;  %v5364_v46 = vld [vmem:[#allocation5 + $0x14c] ss:$16 sps:$4 sm:$0xff]  }
  0x45   :  { %3471 = vmatprep.subr.bf16.mxu0 %v5326_v16  ;;  %4071 = vmatprep.subr.bf16.mxu1 %v5328_v17  ;;  %v1887_v43 = vunpack.c.0.s8 %v1886_v38  ;;  %v5366_v47 = vld [vmem:[#allocation5 + $0x140] ss:$16 sps:$4 sm:$0xff]   ;;  %v5367_v48 = vld [vmem:[#allocation5 + $0x148] ss:$16 sps:$4 sm:$0xff]   ;;  %v5368_v50 = vld [vmem:[#allocation5 + $0x164] ss:$16 sps:$4 sm:$0xff]  }
  0x46   :  { %v5370_v51 = vld [vmem:[#allocation5 + $0x16c] ss:$16 sps:$4 sm:$0xff]   ;;  %v5372_v53 = vld [vmem:[#allocation5 + $0x160] ss:$16 sps:$4 sm:$0xff]   ;;  %v5373_v55 = vld [vmem:[#allocation5 + $0x168] ss:$16 sps:$4 sm:$0xff]  }
  0x47   :  { %v6368_v49 = vsub.s32 %v1887_v43, %v6365_v42  ;;  %v1852_v52 = vld [vmem:[#allocation2] sm:$0xff]  ;;  %v5374_v56 = vld [vmem:[#allocation5 + $0x184] ss:$16 sps:$4 sm:$0xff]   ;;  %s6308_s2 = smov [#allocation8]  }
  0x48   :  { %3473 = vmatpush1.bf16.msra.mxu0 %v5330_v18  ;;  %4073 = vmatpush1.bf16.msra.mxu1 %v5331_v19  ;;  %v5376_v57 = vld [vmem:[#allocation5 + $0x18c] ss:$16 sps:$4 sm:$0xff]   ;;  %v5378_v59 = vld [vmem:[#allocation5 + $0x180] ss:$16 sps:$4 sm:$0xff]   ;;  %v5379_v60 = vld [vmem:[#allocation5 + $0x188] ss:$16 sps:$4 sm:$0xff]   ;;  %v1884_v7 = vcombine.high %v1852_v52, %v1852_v52 }
  0x49   :  { %3475 = vmatprep.subr.bf16.mxu0 %v5332_v20  ;;  %4075 = vmatprep.subr.bf16.mxu1 %v5334_v21  ;;  %v1891_v54 = vrot.slane %v1852_v52, %v6368_v49  ;;  %v5380_v61 = vld [vmem:[#allocation5 + $0x1a4] ss:$16 sps:$4 sm:$0xff]   ;;  %v5382_v62 = vld [vmem:[#allocation5 + $0x1ac] ss:$16 sps:$4 sm:$0xff]   ;;  %v5384_v63 = vld [vmem:[#allocation5 + $0x1a0] ss:$16 sps:$4 sm:$0xff]  }
  0x4a   :  { %v5385_v0 = vld [vmem:[#allocation5 + $0x1a8] ss:$16 sps:$4 sm:$0xff]   ;;  %v5386_v1 = vld [vmem:[#allocation5 + $0x1c4] ss:$16 sps:$4 sm:$0xff]   ;;  %v5388_v2 = vld [vmem:[#allocation5 + $0x1cc] ss:$16 sps:$4 sm:$0xff]   ;;  %v6372_v12 = vrot.slane %v1884_v7, %v6368_v49 }
  0x4b   :  { %v1899_v58 = vcombine.high %v1891_v54, %v1891_v54  ;;  %v5390_v3 = vld [vmem:[#allocation5 + $0x1c0] ss:$16 sps:$4 sm:$0xff]   ;;  %v5391_v4 = vld [vmem:[#allocation5 + $0x1c8] ss:$16 sps:$4 sm:$0xff]   ;;  %v5392_v5 = vld [vmem:[#allocation5 + $0x1e4] ss:$16 sps:$4 sm:$0xff]  }
  0x4c   :  { %3477 = vmatpush1.bf16.msra.mxu0 %v5336_v22  ;;  %4077 = vmatpush1.bf16.msra.mxu1 %v5337_v23  ;;  %v5394_v6 = vld [vmem:[#allocation5 + $0x1ec] ss:$16 sps:$4 sm:$0xff]   ;;  %v5396_v8 = vld [vmem:[#allocation5 + $0x1e0] ss:$16 sps:$4 sm:$0xff]   ;;  %v5397_v9 = vld [vmem:[#allocation5 + $0x1e8] ss:$16 sps:$4 sm:$0xff]   ;;  %v1900_v17 = vcombine.high %v6372_v12, %v6372_v12 }
  0x4d   :  { %3479 = vmatprep.subr.bf16.mxu0 %v5338_v24  ;;  %4079 = vmatprep.subr.bf16.mxu1 %v5340_v25  ;;  %v5399_v10 = vld [vmem:[#allocation5 + $0x204] ss:$16 sps:$4 sm:$0xff]   ;;  %v5402_v11 = vld [vmem:[#allocation5 + $0x20c] ss:$16 sps:$4 sm:$0xff]   ;;  %v5401_v13 = vld [vmem:[#allocation5 + $0x200] ss:$16 sps:$4 sm:$0xff]  }
  0x4e   :  { %2053 = vmatprep.mubr.f32.mxu0 %v1899_v58  ;;  %2763 = vmatprep.mubr.f32.mxu1 %v1899_v58  ;;  %v5404_v14 = vld [vmem:[#allocation5 + $0x208] ss:$16 sps:$4 sm:$0xff]   ;;  %v5405_v15 = vld [vmem:[#allocation5 + $0x224] ss:$16 sps:$4 sm:$0xff]   ;;  %v5408_v16 = vld [vmem:[#allocation5 + $0x22c] ss:$16 sps:$4 sm:$0xff]  }
  0x4f   :  { %v5407_v18 = vld [vmem:[#allocation5 + $0x220] ss:$16 sps:$4 sm:$0xff]   ;;  %v5410_v19 = vld [vmem:[#allocation5 + $0x228] ss:$16 sps:$4 sm:$0xff]   ;;  %v5411_v20 = vld [vmem:[#allocation5 + $0x244] ss:$16 sps:$4 sm:$0xff]  }
  0x50   :  { %3481 = vmatpush1.bf16.msra.mxu0 %v5342_v26  ;;  %4081 = vmatpush1.bf16.msra.mxu1 %v5343_v27  ;;  %v5414_v21 = vld [vmem:[#allocation5 + $0x24c] ss:$16 sps:$4 sm:$0xff]   ;;  %v5413_v22 = vld [vmem:[#allocation5 + $0x240] ss:$16 sps:$4 sm:$0xff]   ;;  %v5416_v23 = vld [vmem:[#allocation5 + $0x248] ss:$16 sps:$4 sm:$0xff]  }
  0x51   :  { %3483 = vmatprep.subr.bf16.mxu0 %v5344_v28  ;;  %4083 = vmatprep.subr.bf16.mxu1 %v5346_v29  ;;  %v5417_v24 = vld [vmem:[#allocation5 + $0x264] ss:$16 sps:$4 sm:$0xff]   ;;  %v5420_v25 = vld [vmem:[#allocation5 + $0x26c] ss:$16 sps:$4 sm:$0xff]   ;;  %v5419_v26 = vld [vmem:[#allocation5 + $0x260] ss:$16 sps:$4 sm:$0xff]  }
  0x52   :  { %v5422_v27 = vld [vmem:[#allocation5 + $0x268] ss:$16 sps:$4 sm:$0xff]   ;;  %v5423_v28 = vld [vmem:[#allocation5 + $0x284] ss:$16 sps:$4 sm:$0xff]   ;;  %v5426_v29 = vld [vmem:[#allocation5 + $0x28c] ss:$16 sps:$4 sm:$0xff]  }
  0x53   :  { %v5435_v36 = vld [vmem:[#allocation5 + $0x2c4] ss:$16 sps:$4 sm:$0xff]   ;;  %v5438_v37 = vld [vmem:[#allocation5 + $0x2cc] ss:$16 sps:$4 sm:$0xff]   ;;  %v5437_v38 = vld [vmem:[#allocation5 + $0x2c0] ss:$16 sps:$4 sm:$0xff]  }
  0x54   :  { %3485 = vmatpush1.bf16.msra.mxu0 %v5348_v30  ;;  %4085 = vmatpush1.bf16.msra.mxu1 %v5349_v31  ;;  %v5425_v30 = vld [vmem:[#allocation5 + $0x280] ss:$16 sps:$4 sm:$0xff]   ;;  %v5428_v31 = vld [vmem:[#allocation5 + $0x288] ss:$16 sps:$4 sm:$0xff]   ;;  %v5465_v58 = vld [vmem:[#allocation5 + $0x364] ss:$16 sps:$4 sm:$0xff]  }
  0x55   :  { %3487 = vmatprep.subr.bf16.mxu0 %v5350_v32  ;;  %4087 = vmatprep.subr.bf16.mxu1 %v5352_v33  ;;  %v5429_v32 = vld [vmem:[#allocation5 + $0x2a4] ss:$16 sps:$4 sm:$0xff]   ;;  %v5432_v33 = vld [vmem:[#allocation5 + $0x2ac] ss:$16 sps:$4 sm:$0xff]   ;;  %v5443_v43 = vld [vmem:[#allocation5 + $0x2e0] ss:$16 sps:$4 sm:$0xff]  }
  0x56   :  { %v5455_v52 = vld [vmem:[#allocation5 + $0x320] ss:$16 sps:$4 sm:$0xff]   ;;  %v5486_v7 = vld [vmem:[#allocation5 + $0x3cc] ss:$16 sps:$4 sm:$0xff]   ;;  %s3442_s21 = sshll.u32 %s6308_s2, 4  ;;  %s3443_s21 = int_to_ptr.vmem [resolvable:$true] %s3442_s21 }
  0x57   :  { %s6273_s22 = scalar_lea.vmem %s3443_s21, 128  ;;  %p6278_p11 = scmp.lt.s32.totalorder %s3443_s21, %s3443_s21 }
  0x58   :  { %3489 = vmatpush1.bf16.msra.mxu0 %v5354_v34  ;;  %4089 = vmatpush1.bf16.msra.mxu1 %v5355_v35  ;;  %v5431_v34 = vld [vmem:[#allocation5 + $0x2a0] ss:$16 sps:$4 sm:$0xff]   ;;  %v5434_v35 = vld [vmem:[#allocation5 + $0x2a8] ss:$16 sps:$4 sm:$0xff]   ;;  %p6274_p10 = scmp.ne.s32.totalorder %s3443_s21, %s6273_s22  ;;  %p6279_p12 = scmp.lt.s32.totalorder %s6273_s22, %s6273_s22 }
  0x59   :  { %3491 = vmatprep.subr.bf16.mxu0 %v5356_v39  ;;  %4091 = vmatprep.subr.bf16.mxu1 %v5358_v40  ;;  %v5440_v39 = vld [vmem:[#allocation5 + $0x2c8] ss:$16 sps:$4 sm:$0xff]   ;;  %v5441_v40 = vld [vmem:[#allocation5 + $0x2e4] ss:$16 sps:$4 sm:$0xff]  }
  0x5a   :  { %p6280_p13 = por %p6279_p12, %p6278_p11 }
  0x5c   :  { %3493 = vmatpush1.bf16.msra.mxu0 %v5360_v41  ;;  %4093 = vmatpush1.bf16.msra.mxu1 %v5361_v44  ;;  %v5444_v41 = vld [vmem:[#allocation5 + $0x2ec] ss:$16 sps:$4 sm:$0xff]   ;;  %v5446_v44 = vld [vmem:[#allocation5 + $0x2e8] ss:$16 sps:$4 sm:$0xff]   ;;  %p6281_p0 = pnand %p6280_p13, %p6274_p10 }
  0x5d   :  { %3495 = vmatprep.subr.bf16.mxu0 %v5362_v45  ;;  %4095 = vmatprep.subr.bf16.mxu1 %v5364_v46  ;;  %v5447_v45 = vld [vmem:[#allocation5 + $0x304] ss:$16 sps:$4 sm:$0xff]   ;;  %v5450_v46 = vld [vmem:[#allocation5 + $0x30c] ss:$16 sps:$4 sm:$0xff]  }
  0x60   :  { %3497 = vmatpush1.bf16.msra.mxu0 %v5366_v47  ;;  %4097 = vmatpush1.bf16.msra.mxu1 %v5367_v48  ;;  %v5449_v47 = vld [vmem:[#allocation5 + $0x300] ss:$16 sps:$4 sm:$0xff]   ;;  %v5452_v48 = vld [vmem:[#allocation5 + $0x308] ss:$16 sps:$4 sm:$0xff]  }
  0x61   :  { %3499 = vmatprep.subr.bf16.mxu0 %v5368_v50  ;;  %4099 = vmatprep.subr.bf16.mxu1 %v5370_v51  ;;  %v5453_v50 = vld [vmem:[#allocation5 + $0x324] ss:$16 sps:$4 sm:$0xff]   ;;  %v5456_v51 = vld [vmem:[#allocation5 + $0x32c] ss:$16 sps:$4 sm:$0xff]  }
  0x64   :  { %3501 = vmatpush1.bf16.msra.mxu0 %v5372_v53  ;;  %4101 = vmatpush1.bf16.msra.mxu1 %v5373_v55  ;;  %v5458_v53 = vld [vmem:[#allocation5 + $0x328] ss:$16 sps:$4 sm:$0xff]   ;;  %v5462_v55 = vld [vmem:[#allocation5 + $0x34c] ss:$16 sps:$4 sm:$0xff]  }
  0x65   :  { %3503 = vmatprep.subr.bf16.mxu0 %v5374_v56  ;;  %4103 = vmatprep.subr.bf16.mxu1 %v5376_v57  ;;  %v5461_v56 = vld [vmem:[#allocation5 + $0x340] ss:$16 sps:$4 sm:$0xff]   ;;  %v5464_v57 = vld [vmem:[#allocation5 + $0x348] ss:$16 sps:$4 sm:$0xff]  }
  0x68   :  { %3505 = vmatpush1.bf16.msra.mxu0 %v5378_v59  ;;  %4105 = vmatpush1.bf16.msra.mxu1 %v5379_v60  ;;  %v5468_v59 = vld [vmem:[#allocation5 + $0x36c] ss:$16 sps:$4 sm:$0xff]   ;;  %v5467_v60 = vld [vmem:[#allocation5 + $0x360] ss:$16 sps:$4 sm:$0xff]  }
  0x69   :  { %3507 = vmatprep.subr.bf16.mxu0 %v5380_v61  ;;  %4107 = vmatprep.subr.bf16.mxu1 %v5382_v62  ;;  %v5470_v61 = vld [vmem:[#allocation5 + $0x368] ss:$16 sps:$4 sm:$0xff]   ;;  %v5471_v62 = vld [vmem:[#allocation5 + $0x384] ss:$16 sps:$4 sm:$0xff]  }
  0x6c   :  { %3509 = vmatpush1.bf16.msra.mxu0 %v5384_v63  ;;  %4109 = vmatpush1.bf16.msra.mxu1 %v5385_v0  ;;  %v5474_v63 = vld [vmem:[#allocation5 + $0x38c] ss:$16 sps:$4 sm:$0xff]   ;;  %v5473_v0 = vld [vmem:[#allocation5 + $0x380] ss:$16 sps:$4 sm:$0xff]  }
  0x6d   :  { %3511 = vmatprep.subr.bf16.mxu0 %v5386_v1  ;;  %4111 = vmatprep.subr.bf16.mxu1 %v5388_v2  ;;  %v5476_v1 = vld [vmem:[#allocation5 + $0x388] ss:$16 sps:$4 sm:$0xff]   ;;  %v5477_v2 = vld [vmem:[#allocation5 + $0x3a4] ss:$16 sps:$4 sm:$0xff]  }
  0x70   :  { %3513 = vmatpush1.bf16.msra.mxu0 %v5390_v3  ;;  %4113 = vmatpush1.bf16.msra.mxu1 %v5391_v4  ;;  %v5480_v3 = vld [vmem:[#allocation5 + $0x3ac] ss:$16 sps:$4 sm:$0xff]   ;;  %v5479_v4 = vld [vmem:[#allocation5 + $0x3a0] ss:$16 sps:$4 sm:$0xff]  }
  0x71   :  { %3515 = vmatprep.subr.bf16.mxu0 %v5392_v5  ;;  %4115 = vmatprep.subr.bf16.mxu1 %v5394_v6  ;;  %v5482_v5 = vld [vmem:[#allocation5 + $0x3a8] ss:$16 sps:$4 sm:$0xff]   ;;  %v5483_v6 = vld [vmem:[#allocation5 + $0x3c4] ss:$16 sps:$4 sm:$0xff]  }
  0x74   :  { %3517 = vmatpush1.bf16.msra.mxu0 %v5396_v8  ;;  %4117 = vmatpush1.bf16.msra.mxu1 %v5397_v9  ;;  %v5485_v8 = vld [vmem:[#allocation5 + $0x3c0] ss:$16 sps:$4 sm:$0xff]   ;;  %v5488_v9 = vld [vmem:[#allocation5 + $0x3c8] ss:$16 sps:$4 sm:$0xff]  }
  0x75   :  { %3519 = vmatprep.subr.bf16.mxu0 %v5399_v10  ;;  %4119 = vmatprep.subr.bf16.mxu1 %v5402_v11  ;;  %v5489_v10 = vld [vmem:[#allocation5 + $0x3e4] ss:$16 sps:$4 sm:$0xff]   ;;  %v5492_v11 = vld [vmem:[#allocation5 + $0x3ec] ss:$16 sps:$4 sm:$0xff]  }
  0x77   :  { %2054 = vmatmul.mubr.f32.vlgmr.msra.gmra.mrb[0].mxu0 %v1891_v54  ;;  %2764 = vmatmul.mubr.f32.vlgmr.msra.gmra.mrb[0].mxu1 %v1891_v54  ;;  %v5459_v54 = vld [vmem:[#allocation5 + $0x344] ss:$16 sps:$4 sm:$0xff]  }
  0x78   :  { %3521 = vmatpush1.bf16.msra.mxu0 %v5401_v13  ;;  %4121 = vmatpush1.bf16.msra.mxu1 %v5404_v14  ;;  %v5491_v13 = vld [vmem:[#allocation5 + $0x3e0] ss:$16 sps:$4 sm:$0xff]   ;;  %v5494_v14 = vld [vmem:[#allocation5 + $0x3e8] ss:$16 sps:$4 sm:$0xff]  }
  0x79   :  { %3523 = vmatprep.subr.bf16.mxu0 %v5405_v15  ;;  %4123 = vmatprep.subr.bf16.mxu1 %v5408_v16  ;;  %v5495_v15 = vld [vmem:[#allocation5 + $0x404] ss:$16 sps:$4 sm:$0xff]   ;;  %v5498_v16 = vld [vmem:[#allocation5 + $0x40c] ss:$16 sps:$4 sm:$0xff]  }
  0x7a   :  { %2124 = vmatprep.mubr.f32.mxu0 %v1900_v17  ;;  %2834 = vmatprep.mubr.f32.mxu1 %v1900_v17  ;;  %v5497_v17 = vld [vmem:[#allocation5 + $0x400] ss:$16 sps:$4 sm:$0xff]  }
  0x7c   :  { %3525 = vmatpush1.bf16.msra.mxu0 %v5407_v18  ;;  %4125 = vmatpush1.bf16.msra.mxu1 %v5410_v19  ;;  %v5500_v18 = vld [vmem:[#allocation5 + $0x408] ss:$16 sps:$4 sm:$0xff]  }
  0x7d   :  { %3527 = vmatprep.subr.bf16.mxu0 %v5411_v20  ;;  %4127 = vmatprep.subr.bf16.mxu1 %v5414_v21  ;;  %v6376_v19 = vld [vmem:[#allocation2 + $0x8] sm:$0xff]  ;;  %v5504_v21 = vld [vmem:[#allocation5 + $0x42c] ss:$16 sps:$4 sm:$0xff]  }
  0x7e   :  { %v5501_v20 = vld [vmem:[#allocation5 + $0x424] ss:$16 sps:$4 sm:$0xff]  }
  0x80   :  { %3529 = vmatpush1.bf16.msra.mxu0 %v5413_v22  ;;  %4129 = vmatpush1.bf16.msra.mxu1 %v5416_v23  ;;  %v6380_v22 = vrot.slane %v6376_v19, %v6368_v49 }
  0x81   :  { %3531 = vmatprep.subr.bf16.mxu0 %v5417_v24  ;;  %4131 = vmatprep.subr.bf16.mxu1 %v5420_v25  ;;  %v5503_v24 = vld [vmem:[#allocation5 + $0x420] ss:$16 sps:$4 sm:$0xff]   ;;  %v5506_v25 = vld [vmem:[#allocation5 + $0x428] ss:$16 sps:$4 sm:$0xff]  }
  0x82   :  { %v1916_v23 = vcombine.high %v6380_v22, %v6380_v22 }
  0x84   :  { %3533 = vmatpush1.bf16.msra.mxu0 %v5419_v26  ;;  %4133 = vmatpush1.bf16.msra.mxu1 %v5422_v27  ;;  %v5507_v26 = vld [vmem:[#allocation5 + $0x444] ss:$16 sps:$4 sm:$0xff]   ;;  %v5510_v27 = vld [vmem:[#allocation5 + $0x44c] ss:$16 sps:$4 sm:$0xff]  }
  0x85   :  { %3535 = vmatprep.subr.bf16.mxu0 %v5423_v28  ;;  %4135 = vmatprep.subr.bf16.mxu1 %v5426_v29  ;;  %v5509_v28 = vld [vmem:[#allocation5 + $0x440] ss:$16 sps:$4 sm:$0xff]   ;;  %v5512_v29 = vld [vmem:[#allocation5 + $0x448] ss:$16 sps:$4 sm:$0xff]  }
  0x88   :  { %3537 = vmatpush1.bf16.msra.mxu0 %v5425_v30  ;;  %4137 = vmatpush1.bf16.msra.mxu1 %v5428_v31  ;;  %v5516_v30 = vld [vmem:[#allocation5 + $0x46c] ss:$16 sps:$4 sm:$0xff]   ;;  %v5515_v31 = vld [vmem:[#allocation5 + $0x460] ss:$16 sps:$4 sm:$0xff]  }
  0x89   :  { %3539 = vmatprep.subr.bf16.mxu0 %v5429_v32  ;;  %4139 = vmatprep.subr.bf16.mxu1 %v5432_v33  ;;  %v5518_v32 = vld [vmem:[#allocation5 + $0x468] ss:$16 sps:$4 sm:$0xff]   ;;  %v5519_v33 = vld [vmem:[#allocation5 + $0x484] ss:$16 sps:$4 sm:$0xff]  }
  0x8c   :  { %3541 = vmatpush1.bf16.msra.mxu0 %v5431_v34  ;;  %4141 = vmatpush1.bf16.msra.mxu1 %v5434_v35  ;;  %v5522_v34 = vld [vmem:[#allocation5 + $0x48c] ss:$16 sps:$4 sm:$0xff]   ;;  %v5521_v35 = vld [vmem:[#allocation5 + $0x480] ss:$16 sps:$4 sm:$0xff]  }
  0x8d   :  { %3543 = vmatprep.subr.bf16.mxu0 %v5435_v36  ;;  %4143 = vmatprep.subr.bf16.mxu1 %v5438_v37  ;;  %v5524_v36 = vld [vmem:[#allocation5 + $0x488] ss:$16 sps:$4 sm:$0xff]   ;;  %v5525_v37 = vld [vmem:[#allocation5 + $0x4a4] ss:$16 sps:$4 sm:$0xff]  }
  0x90   :  { %3545 = vmatpush1.bf16.msra.mxu0 %v5437_v38  ;;  %4145 = vmatpush1.bf16.msra.mxu1 %v5440_v39  ;;  %v5528_v38 = vld [vmem:[#allocation5 + $0x4ac] ss:$16 sps:$4 sm:$0xff]   ;;  %v5527_v39 = vld [vmem:[#allocation5 + $0x4a0] ss:$16 sps:$4 sm:$0xff]  }
  0x91   :  { %3547 = vmatprep.subr.bf16.mxu0 %v5441_v40  ;;  %4147 = vmatprep.subr.bf16.mxu1 %v5444_v41  ;;  %v5530_v40 = vld [vmem:[#allocation5 + $0x4a8] ss:$16 sps:$4 sm:$0xff]   ;;  %v5531_v41 = vld [vmem:[#allocation5 + $0x4c4] ss:$16 sps:$4 sm:$0xff]  }
  0x94   :  { %3549 = vmatpush1.bf16.msra.mxu0 %v5443_v43  ;;  %4149 = vmatpush1.bf16.msra.mxu1 %v5446_v44  ;;  %v5534_v43 = vld [vmem:[#allocation5 + $0x4cc] ss:$16 sps:$4 sm:$0xff]   ;;  %v5533_v44 = vld [vmem:[#allocation5 + $0x4c0] ss:$16 sps:$4 sm:$0xff]  }
  0x95   :  { %3551 = vmatprep.subr.bf16.mxu0 %v5447_v45  ;;  %4151 = vmatprep.subr.bf16.mxu1 %v5450_v46  ;;  %v5536_v45 = vld [vmem:[#allocation5 + $0x4c8] ss:$16 sps:$4 sm:$0xff]   ;;  %v5537_v46 = vld [vmem:[#allocation5 + $0x4e4] ss:$16 sps:$4 sm:$0xff]  }
  0x98   :  { %3553 = vmatpush1.bf16.msra.mxu0 %v5449_v47  ;;  %4153 = vmatpush1.bf16.msra.mxu1 %v5452_v48  ;;  %v5540_v47 = vld [vmem:[#allocation5 + $0x4ec] ss:$16 sps:$4 sm:$0xff]   ;;  %v5539_v48 = vld [vmem:[#allocation5 + $0x4e0] ss:$16 sps:$4 sm:$0xff]  }
  0x99   :  { %3555 = vmatprep.subr.bf16.mxu0 %v5453_v50  ;;  %4155 = vmatprep.subr.bf16.mxu1 %v5456_v51  ;;  %v5542_v50 = vld [vmem:[#allocation5 + $0x4e8] ss:$16 sps:$4 sm:$0xff]   ;;  %v5543_v51 = vld [vmem:[#allocation5 + $0x504] ss:$16 sps:$4 sm:$0xff]  }
  0x9c   :  { %3557 = vmatpush1.bf16.msra.mxu0 %v5455_v52  ;;  %4157 = vmatpush1.bf16.msra.mxu1 %v5458_v53  ;;  %v5546_v52 = vld [vmem:[#allocation5 + $0x50c] ss:$16 sps:$4 sm:$0xff]   ;;  %v5545_v53 = vld [vmem:[#allocation5 + $0x500] ss:$16 sps:$4 sm:$0xff]  }
  0x9d   :  { %3559 = vmatprep.subr.bf16.mxu0 %v5459_v54  ;;  %4159 = vmatprep.subr.bf16.mxu1 %v5462_v55  ;;  %v5548_v54 = vld [vmem:[#allocation5 + $0x508] ss:$16 sps:$4 sm:$0xff]   ;;  %v5549_v55 = vld [vmem:[#allocation5 + $0x524] ss:$16 sps:$4 sm:$0xff]  }
  0xa0   :  { %3561 = vmatpush1.bf16.msra.mxu0 %v5461_v56  ;;  %4161 = vmatpush1.bf16.msra.mxu1 %v5464_v57  ;;  %v5552_v56 = vld [vmem:[#allocation5 + $0x52c] ss:$16 sps:$4 sm:$0xff]   ;;  %v5551_v57 = vld [vmem:[#allocation5 + $0x520] ss:$16 sps:$4 sm:$0xff]  }
  0xa1   :  { %3563 = vmatprep.subr.bf16.mxu0 %v5465_v58  ;;  %4163 = vmatprep.subr.bf16.mxu1 %v5468_v59  ;;  %v5554_v58 = vld [vmem:[#allocation5 + $0x528] ss:$16 sps:$4 sm:$0xff]   ;;  %v5555_v59 = vld [vmem:[#allocation5 + $0x544] ss:$16 sps:$4 sm:$0xff]  }
  0xa4   :  { %3565 = vmatpush1.bf16.msra.mxu0 %v5467_v60  ;;  %4165 = vmatpush1.bf16.msra.mxu1 %v5470_v61  ;;  %v5558_v60 = vld [vmem:[#allocation5 + $0x54c] ss:$16 sps:$4 sm:$0xff]   ;;  %v5557_v61 = vld [vmem:[#allocation5 + $0x540] ss:$16 sps:$4 sm:$0xff]  }
  0xa5   :  { %3567 = vmatprep.subr.bf16.mxu0 %v5471_v62  ;;  %4167 = vmatprep.subr.bf16.mxu1 %v5474_v63  ;;  %v5560_v62 = vld [vmem:[#allocation5 + $0x548] ss:$16 sps:$4 sm:$0xff]   ;;  %v5561_v63 = vld [vmem:[#allocation5 + $0x564] ss:$16 sps:$4 sm:$0xff]  }
  0xa8   :  { %3569 = vmatpush1.bf16.msra.mxu0 %v5473_v0  ;;  %4169 = vmatpush1.bf16.msra.mxu1 %v5476_v1  ;;  %v5564_v0 = vld [vmem:[#allocation5 + $0x56c] ss:$16 sps:$4 sm:$0xff]   ;;  %v5563_v1 = vld [vmem:[#allocation5 + $0x560] ss:$16 sps:$4 sm:$0xff]  }
  0xa9   :  { %3571 = vmatprep.subr.bf16.mxu0 %v5477_v2  ;;  %4171 = vmatprep.subr.bf16.mxu1 %v5480_v3  ;;  %v5566_v2 = vld [vmem:[#allocation5 + $0x568] ss:$16 sps:$4 sm:$0xff]   ;;  %v5567_v3 = vld [vmem:[#allocation5 + $0x584] ss:$16 sps:$4 sm:$0xff]  }
  0xac   :  { %3573 = vmatpush1.bf16.msra.mxu0 %v5479_v4  ;;  %4173 = vmatpush1.bf16.msra.mxu1 %v5482_v5  ;;  %v5570_v4 = vld [vmem:[#allocation5 + $0x58c] ss:$16 sps:$4 sm:$0xff]   ;;  %v5569_v5 = vld [vmem:[#allocation5 + $0x580] ss:$16 sps:$4 sm:$0xff]  }
  0xad   :  { %3575 = vmatprep.subr.bf16.mxu0 %v5483_v6  ;;  %4175 = vmatprep.subr.bf16.mxu1 %v5486_v7  ;;  %v5572_v6 = vld [vmem:[#allocation5 + $0x588] ss:$16 sps:$4 sm:$0xff]   ;;  %v5573_v7 = vld [vmem:[#allocation5 + $0x5a4] ss:$16 sps:$4 sm:$0xff]  }
  0xb0   :  { %3577 = vmatpush1.bf16.msra.mxu0 %v5485_v8  ;;  %4177 = vmatpush1.bf16.msra.mxu1 %v5488_v9  ;;  %v5576_v8 = vld [vmem:[#allocation5 + $0x5ac] ss:$16 sps:$4 sm:$0xff]   ;;  %v5575_v9 = vld [vmem:[#allocation5 + $0x5a0] ss:$16 sps:$4 sm:$0xff]  }
  0xb1   :  { %3579 = vmatprep.subr.bf16.mxu0 %v5489_v10  ;;  %4179 = vmatprep.subr.bf16.mxu1 %v5492_v11  ;;  %v5578_v10 = vld [vmem:[#allocation5 + $0x5a8] ss:$16 sps:$4 sm:$0xff]   ;;  %v5579_v11 = vld [vmem:[#allocation5 + $0x5c4] ss:$16 sps:$4 sm:$0xff]  }
  0xb4   :  { %3581 = vmatpush1.bf16.msra.mxu0 %v5491_v13  ;;  %4181 = vmatpush1.bf16.msra.mxu1 %v5494_v14  ;;  %v5582_v13 = vld [vmem:[#allocation5 + $0x5cc] ss:$16 sps:$4 sm:$0xff]   ;;  %v5581_v14 = vld [vmem:[#allocation5 + $0x5c0] ss:$16 sps:$4 sm:$0xff]  }
  0xb5   :  { %3583 = vmatprep.subr.bf16.mxu0 %v5495_v15  ;;  %4183 = vmatprep.subr.bf16.mxu1 %v5498_v16  ;;  %v5584_v15 = vld [vmem:[#allocation5 + $0x5c8] ss:$16 sps:$4 sm:$0xff]   ;;  %v5585_v16 = vld [vmem:[#allocation5 + $0x5e4] ss:$16 sps:$4 sm:$0xff]  }
  0xb7   :  { %2125 = vmatmul.mubr.f32.vlgmr.msra.gmra.mrb[0].mxu0 %v6372_v12  ;;  %2835 = vmatmul.mubr.f32.vlgmr.msra.gmra.mrb[0].mxu1 %v6372_v12  ;;  %v5513_v12 = vld [vmem:[#allocation5 + $0x464] ss:$16 sps:$4 sm:$0xff]  }
  0xb8   :  { %3585 = vmatpush1.bf16.msra.mxu0 %v5497_v17  ;;  %4185 = vmatpush1.bf16.msra.mxu1 %v5500_v18  ;;  %v5588_v17 = vld [vmem:[#allocation5 + $0x5ec] ss:$16 sps:$4 sm:$0xff]   ;;  %v1901_v18 = vcombine.high %v6376_v19, %v6376_v19 }
  0xb9   :  { %3587 = vmatprep.subr.bf16.mxu0 %v5501_v20  ;;  %4187 = vmatprep.subr.bf16.mxu1 %v5504_v21  ;;  %v5587_v20 = vld [vmem:[#allocation5 + $0x5e0] ss:$16 sps:$4 sm:$0xff]   ;;  %v5590_v21 = vld [vmem:[#allocation5 + $0x5e8] ss:$16 sps:$4 sm:$0xff]  }
  0xba   :  { %2195 = vmatprep.mubr.f32.mxu0 %v1916_v23  ;;  %2905 = vmatprep.mubr.f32.mxu1 %v1916_v23  ;;  %v5591_v23 = vld [vmem:[#allocation5 + $0x604] ss:$16 sps:$4 sm:$0xff]  }
  0xbc   :  { %3589 = vmatpush1.bf16.msra.mxu0 %v5503_v24  ;;  %4189 = vmatpush1.bf16.msra.mxu1 %v5506_v25  ;;  %v5594_v24 = vld [vmem:[#allocation5 + $0x60c] ss:$16 sps:$4 sm:$0xff]   ;;  %v6389_v25 = vrot.slane %v1901_v18, %v6368_v49 }
  0xbd   :  { %3591 = vmatprep.subr.bf16.mxu0 %v5507_v26  ;;  %4191 = vmatprep.subr.bf16.mxu1 %v5510_v27  ;;  %v5593_v26 = vld [vmem:[#allocation5 + $0x600] ss:$16 sps:$4 sm:$0xff]   ;;  %v5596_v27 = vld [vmem:[#allocation5 + $0x608] ss:$16 sps:$4 sm:$0xff]   ;;  %v5678_v18 = vld [vmem:[#allocation5 + $0x7cc] ss:$16 sps:$4 sm:$0xff]  }
  0xbe   :  { %v1917_v19 = vcombine.high %v6389_v25, %v6389_v25 }
  0xc0   :  { %3593 = vmatpush1.bf16.msra.mxu0 %v5509_v28  ;;  %4193 = vmatpush1.bf16.msra.mxu1 %v5512_v29  ;;  %v5597_v28 = vld [vmem:[#allocation5 + $0x624] ss:$16 sps:$4 sm:$0xff]   ;;  %v5600_v29 = vld [vmem:[#allocation5 + $0x62c] ss:$16 sps:$4 sm:$0xff]  }
  0xc1   :  { %3595 = vmatprep.subr.bf16.mxu0 %v5513_v12  ;;  %4195 = vmatprep.subr.bf16.mxu1 %v5516_v30  ;;  %v5599_v12 = vld [vmem:[#allocation5 + $0x620] ss:$16 sps:$4 sm:$0xff]   ;;  %v5602_v30 = vld [vmem:[#allocation5 + $0x628] ss:$16 sps:$4 sm:$0xff]  }
  0xc4   :  { %3597 = vmatpush1.bf16.msra.mxu0 %v5515_v31  ;;  %4197 = vmatpush1.bf16.msra.mxu1 %v5518_v32  ;;  %v5603_v31 = vld [vmem:[#allocation5 + $0x644] ss:$16 sps:$4 sm:$0xff]   ;;  %v5606_v32 = vld [vmem:[#allocation5 + $0x64c] ss:$16 sps:$4 sm:$0xff]  }
  0xc5   :  { %3599 = vmatprep.subr.bf16.mxu0 %v5519_v33  ;;  %4199 = vmatprep.subr.bf16.mxu1 %v5522_v34  ;;  %v5605_v33 = vld [vmem:[#allocation5 + $0x640] ss:$16 sps:$4 sm:$0xff]   ;;  %v5608_v34 = vld [vmem:[#allocation5 + $0x648] ss:$16 sps:$4 sm:$0xff]  }
  0xc8   :  { %3601 = vmatpush1.bf16.msra.mxu0 %v5521_v35  ;;  %4201 = vmatpush1.bf16.msra.mxu1 %v5524_v36  ;;  %v5609_v35 = vld [vmem:[#allocation5 + $0x664] ss:$16 sps:$4 sm:$0xff]   ;;  %v5612_v36 = vld [vmem:[#allocation5 + $0x66c] ss:$16 sps:$4 sm:$0xff]  }
  0xc9   :  { %3603 = vmatprep.subr.bf16.mxu0 %v5525_v37  ;;  %4203 = vmatprep.subr.bf16.mxu1 %v5528_v38  ;;  %v5614_v37 = vld [vmem:[#allocation5 + $0x668] ss:$16 sps:$4 sm:$0xff]   ;;  %v5615_v38 = vld [vmem:[#allocation5 + $0x684] ss:$16 sps:$4 sm:$0xff]  }
  0xcc   :  { %3605 = vmatpush1.bf16.msra.mxu0 %v5527_v39  ;;  %4205 = vmatpush1.bf16.msra.mxu1 %v5530_v40  ;;  %v5618_v39 = vld [vmem:[#allocation5 + $0x68c] ss:$16 sps:$4 sm:$0xff]   ;;  %v5617_v40 = vld [vmem:[#allocation5 + $0x680] ss:$16 sps:$4 sm:$0xff]  }
  0xcd   :  { %3607 = vmatprep.subr.bf16.mxu0 %v5531_v41  ;;  %4207 = vmatprep.subr.bf16.mxu1 %v5534_v43  ;;  %v5620_v41 = vld [vmem:[#allocation5 + $0x688] ss:$16 sps:$4 sm:$0xff]   ;;  %v5621_v43 = vld [vmem:[#allocation5 + $0x6a4] ss:$16 sps:$4 sm:$0xff]  }
  0xd0   :  { %3609 = vmatpush1.bf16.msra.mxu0 %v5533_v44  ;;  %4209 = vmatpush1.bf16.msra.mxu1 %v5536_v45  ;;  %v5624_v44 = vld [vmem:[#allocation5 + $0x6ac] ss:$16 sps:$4 sm:$0xff]   ;;  %v5623_v45 = vld [vmem:[#allocation5 + $0x6a0] ss:$16 sps:$4 sm:$0xff]  }
  0xd1   :  { %3611 = vmatprep.subr.bf16.mxu0 %v5537_v46  ;;  %4211 = vmatprep.subr.bf16.mxu1 %v5540_v47  ;;  %v5626_v46 = vld [vmem:[#allocation5 + $0x6a8] ss:$16 sps:$4 sm:$0xff]   ;;  %v5627_v47 = vld [vmem:[#allocation5 + $0x6c4] ss:$16 sps:$4 sm:$0xff]  }
  0xd4   :  { %3613 = vmatpush1.bf16.msra.mxu0 %v5539_v48  ;;  %4213 = vmatpush1.bf16.msra.mxu1 %v5542_v50  ;;  %v5630_v48 = vld [vmem:[#allocation5 + $0x6cc] ss:$16 sps:$4 sm:$0xff]   ;;  %v5629_v50 = vld [vmem:[#allocation5 + $0x6c0] ss:$16 sps:$4 sm:$0xff]  }
  0xd5   :  { %3615 = vmatprep.subr.bf16.mxu0 %v5543_v51  ;;  %4215 = vmatprep.subr.bf16.mxu1 %v5546_v52  ;;  %v5632_v51 = vld [vmem:[#allocation5 + $0x6c8] ss:$16 sps:$4 sm:$0xff]   ;;  %v5633_v52 = vld [vmem:[#allocation5 + $0x6e4] ss:$16 sps:$4 sm:$0xff]  }
  0xd8   :  { %3617 = vmatpush1.bf16.msra.mxu0 %v5545_v53  ;;  %4217 = vmatpush1.bf16.msra.mxu1 %v5548_v54  ;;  %v5636_v53 = vld [vmem:[#allocation5 + $0x6ec] ss:$16 sps:$4 sm:$0xff]   ;;  %v5635_v54 = vld [vmem:[#allocation5 + $0x6e0] ss:$16 sps:$4 sm:$0xff]  }
  0xd9   :  { %3619 = vmatprep.subr.bf16.mxu0 %v5549_v55  ;;  %4219 = vmatprep.subr.bf16.mxu1 %v5552_v56  ;;  %v5638_v55 = vld [vmem:[#allocation5 + $0x6e8] ss:$16 sps:$4 sm:$0xff]   ;;  %v5639_v56 = vld [vmem:[#allocation5 + $0x704] ss:$16 sps:$4 sm:$0xff]  }
  0xdc   :  { %3621 = vmatpush1.bf16.msra.mxu0 %v5551_v57  ;;  %4221 = vmatpush1.bf16.msra.mxu1 %v5554_v58  ;;  %v5642_v57 = vld [vmem:[#allocation5 + $0x70c] ss:$16 sps:$4 sm:$0xff]   ;;  %v5641_v58 = vld [vmem:[#allocation5 + $0x700] ss:$16 sps:$4 sm:$0xff]  }
  0xdd   :  { %3623 = vmatprep.subr.bf16.mxu0 %v5555_v59  ;;  %4223 = vmatprep.subr.bf16.mxu1 %v5558_v60  ;;  %v5644_v59 = vld [vmem:[#allocation5 + $0x708] ss:$16 sps:$4 sm:$0xff]   ;;  %v5645_v60 = vld [vmem:[#allocation5 + $0x724] ss:$16 sps:$4 sm:$0xff]  }
  0xe0   :  { %3625 = vmatpush1.bf16.msra.mxu0 %v5557_v61  ;;  %4225 = vmatpush1.bf16.msra.mxu1 %v5560_v62  ;;  %v5648_v61 = vld [vmem:[#allocation5 + $0x72c] ss:$16 sps:$4 sm:$0xff]   ;;  %v5647_v62 = vld [vmem:[#allocation5 + $0x720] ss:$16 sps:$4 sm:$0xff]  }
  0xe1   :  { %3627 = vmatprep.subr.bf16.mxu0 %v5561_v63  ;;  %4227 = vmatprep.subr.bf16.mxu1 %v5564_v0  ;;  %v5650_v63 = vld [vmem:[#allocation5 + $0x728] ss:$16 sps:$4 sm:$0xff]   ;;  %v5651_v0 = vld [vmem:[#allocation5 + $0x744] ss:$16 sps:$4 sm:$0xff]  }
  0xe4   :  { %3629 = vmatpush1.bf16.msra.mxu0 %v5563_v1  ;;  %4229 = vmatpush1.bf16.msra.mxu1 %v5566_v2  ;;  %v5654_v1 = vld [vmem:[#allocation5 + $0x74c] ss:$16 sps:$4 sm:$0xff]   ;;  %v5653_v2 = vld [vmem:[#allocation5 + $0x740] ss:$16 sps:$4 sm:$0xff]  }
  0xe5   :  { %3631 = vmatprep.subr.bf16.mxu0 %v5567_v3  ;;  %4231 = vmatprep.subr.bf16.mxu1 %v5570_v4  ;;  %v5656_v3 = vld [vmem:[#allocation5 + $0x748] ss:$16 sps:$4 sm:$0xff]   ;;  %v5657_v4 = vld [vmem:[#allocation5 + $0x764] ss:$16 sps:$4 sm:$0xff]  }
  0xe8   :  { %3633 = vmatpush1.bf16.msra.mxu0 %v5569_v5  ;;  %4233 = vmatpush1.bf16.msra.mxu1 %v5572_v6  ;;  %v5660_v5 = vld [vmem:[#allocation5 + $0x76c] ss:$16 sps:$4 sm:$0xff]   ;;  %v5659_v6 = vld [vmem:[#allocation5 + $0x760] ss:$16 sps:$4 sm:$0xff]  }
  0xe9   :  { %3635 = vmatprep.subr.bf16.mxu0 %v5573_v7  ;;  %4235 = vmatprep.subr.bf16.mxu1 %v5576_v8  ;;  %v5662_v7 = vld [vmem:[#allocation5 + $0x768] ss:$16 sps:$4 sm:$0xff]   ;;  %v5663_v8 = vld [vmem:[#allocation5 + $0x784] ss:$16 sps:$4 sm:$0xff]  }
  0xec   :  { %3637 = vmatpush1.bf16.msra.mxu0 %v5575_v9  ;;  %4237 = vmatpush1.bf16.msra.mxu1 %v5578_v10  ;;  %v5666_v9 = vld [vmem:[#allocation5 + $0x78c] ss:$16 sps:$4 sm:$0xff]   ;;  %v5665_v10 = vld [vmem:[#allocation5 + $0x780] ss:$16 sps:$4 sm:$0xff]  }
  0xed   :  { %3639 = vmatprep.subr.bf16.mxu0 %v5579_v11  ;;  %4239 = vmatprep.subr.bf16.mxu1 %v5582_v13  ;;  %v5668_v11 = vld [vmem:[#allocation5 + $0x788] ss:$16 sps:$4 sm:$0xff]   ;;  %v5669_v13 = vld [vmem:[#allocation5 + $0x7a4] ss:$16 sps:$4 sm:$0xff]  }
  0xf0   :  { %3641 = vmatpush1.bf16.msra.mxu0 %v5581_v14  ;;  %4241 = vmatpush1.bf16.msra.mxu1 %v5584_v15  ;;  %v5672_v14 = vld [vmem:[#allocation5 + $0x7ac] ss:$16 sps:$4 sm:$0xff]   ;;  %v5671_v15 = vld [vmem:[#allocation5 + $0x7a0] ss:$16 sps:$4 sm:$0xff]  }
  0xf1   :  { %3643 = vmatprep.subr.bf16.mxu0 %v5585_v16  ;;  %4243 = vmatprep.subr.bf16.mxu1 %v5588_v17  ;;  %v5674_v16 = vld [vmem:[#allocation5 + $0x7a8] ss:$16 sps:$4 sm:$0xff]   ;;  %v5675_v17 = vld [vmem:[#allocation5 + $0x7c4] ss:$16 sps:$4 sm:$0xff]  }
  0xf4   :  { %3645 = vmatpush1.bf16.msra.mxu0 %v5587_v20  ;;  %4245 = vmatpush1.bf16.msra.mxu1 %v5590_v21  ;;  %v5677_v20 = vld [vmem:[#allocation5 + $0x7c0] ss:$16 sps:$4 sm:$0xff]   ;;  %v5680_v21 = vld [vmem:[#allocation5 + $0x7c8] ss:$16 sps:$4 sm:$0xff]  }
  0xf5   :  { %3647 = vmatprep.subr.bf16.mxu0 %v5591_v23  ;;  %4247 = vmatprep.subr.bf16.mxu1 %v5594_v24  ;;  %v5681_v23 = vld [vmem:[#allocation5 + $0x7e4] ss:$16 sps:$4 sm:$0xff]   ;;  %v5684_v24 = vld [vmem:[#allocation5 + $0x7ec] ss:$16 sps:$4 sm:$0xff]  }
  0xf7   :  { %2196 = vmatmul.mubr.f32.vlgmr.msra.gmra.mrb[0].mxu0 %v6380_v22  ;;  %2906 = vmatmul.mubr.f32.vlgmr.msra.gmra.mrb[0].mxu1 %v6380_v22  ;;  %v5611_v22 = vld [vmem:[#allocation5 + $0x660] ss:$16 sps:$4 sm:$0xff]  }
  0xf8   :  { %3649 = vmatpush1.bf16.msra.mxu0 %v5593_v26  ;;  %4249 = vmatpush1.bf16.msra.mxu1 %v5596_v27  ;;  %v5683_v26 = vld [vmem:[#allocation5 + $0x7e0] ss:$16 sps:$4 sm:$0xff]  }
  0xf9   :  { %3651 = vmatprep.subr.bf16.mxu0 %v5597_v28  ;;  %4251 = vmatprep.subr.bf16.mxu1 %v5600_v29  ;;  %v6395_v27 = vld [vmem:[#allocation2 + $0x10] sm:$0xff]  ;;  %v5688_v29 = vld [vmem:[#allocation5 + $0x804] ss:$16 sps:$4 sm:$0xff]  }
  0xfa   :  { %2266 = vmatprep.mubr.f32.mxu0 %v1917_v19  ;;  %2976 = vmatprep.mubr.f32.mxu1 %v1917_v19  ;;  %v5686_v28 = vld [vmem:[#allocation5 + $0x7e8] ss:$16 sps:$4 sm:$0xff]   ;;  %v5691_v19 = vld [vmem:[#allocation5 + $0x80c] ss:$16 sps:$4 sm:$0xff]  }
  0xfc   :  { %3653 = vmatpush1.bf16.msra.mxu0 %v5599_v12  ;;  %4253 = vmatpush1.bf16.msra.mxu1 %v5602_v30  ;;  %v6399_v12 = vrot.slane %v6395_v27, %v6368_v49  ;;  %v5690_v30 = vld [vmem:[#allocation5 + $0x800] ss:$16 sps:$4 sm:$0xff]  }
  0xfd   :  { %3655 = vmatprep.subr.bf16.mxu0 %v5603_v31  ;;  %4255 = vmatprep.subr.bf16.mxu1 %v5606_v32  ;;  %v5693_v31 = vld [vmem:[#allocation5 + $0x808] ss:$16 sps:$4 sm:$0xff]   ;;  %v5694_v32 = vld [vmem:[#allocation5 + $0x824] ss:$16 sps:$4 sm:$0xff]  }
 0x100   :  { %3657 = vmatpush1.bf16.msra.mxu0 %v5605_v33  ;;  %4257 = vmatpush1.bf16.msra.mxu1 %v5608_v34  ;;  %v5697_v33 = vld [vmem:[#allocation5 + $0x82c] ss:$16 sps:$4 sm:$0xff]   ;;  %v1933_v34 = vcombine.high %v6399_v12, %v6399_v12 }
 0x101   :  { %3659 = vmatprep.subr.bf16.mxu0 %v5609_v35  ;;  %4259 = vmatprep.subr.bf16.mxu1 %v5612_v36  ;;  %v5696_v35 = vld [vmem:[#allocation5 + $0x820] ss:$16 sps:$4 sm:$0xff]   ;;  %v5699_v36 = vld [vmem:[#allocation5 + $0x828] ss:$16 sps:$4 sm:$0xff]  }
 0x104   :  { %3661 = vmatpush1.bf16.msra.mxu0 %v5611_v22  ;;  %4261 = vmatpush1.bf16.msra.mxu1 %v5614_v37  ;;  %v5700_v22 = vld [vmem:[#allocation5 + $0x844] ss:$16 sps:$4 sm:$0xff]   ;;  %v5703_v37 = vld [vmem:[#allocation5 + $0x84c] ss:$16 sps:$4 sm:$0xff]  }
 0x105   :  { %3663 = vmatprep.subr.bf16.mxu0 %v5615_v38  ;;  %4263 = vmatprep.subr.bf16.mxu1 %v5618_v39  ;;  %v5702_v38 = vld [vmem:[#allocation5 + $0x840] ss:$16 sps:$4 sm:$0xff]   ;;  %v5705_v39 = vld [vmem:[#allocation5 + $0x848] ss:$16 sps:$4 sm:$0xff]  }
 0x108   :  { %3665 = vmatpush1.bf16.msra.mxu0 %v5617_v40  ;;  %4265 = vmatpush1.bf16.msra.mxu1 %v5620_v41  ;;  %v5706_v40 = vld [vmem:[#allocation5 + $0x864] ss:$16 sps:$4 sm:$0xff]   ;;  %v5709_v41 = vld [vmem:[#allocation5 + $0x86c] ss:$16 sps:$4 sm:$0xff]  }
 0x109   :  { %3667 = vmatprep.subr.bf16.mxu0 %v5621_v43  ;;  %4267 = vmatprep.subr.bf16.mxu1 %v5624_v44  ;;  %v5708_v43 = vld [vmem:[#allocation5 + $0x860] ss:$16 sps:$4 sm:$0xff]   ;;  %v5712_v44 = vld [vmem:[#allocation5 + $0x884] ss:$16 sps:$4 sm:$0xff]  }
 0x10c   :  { %3669 = vmatpush1.bf16.msra.mxu0 %v5623_v45  ;;  %4269 = vmatpush1.bf16.msra.mxu1 %v5626_v46  ;;  %v5715_v45 = vld [vmem:[#allocation5 + $0x88c] ss:$16 sps:$4 sm:$0xff]   ;;  %v5714_v46 = vld [vmem:[#allocation5 + $0x880] ss:$16 sps:$4 sm:$0xff]  }
 0x10d   :  { %3671 = vmatprep.subr.bf16.mxu0 %v5627_v47  ;;  %4271 = vmatprep.subr.bf16.mxu1 %v5630_v48  ;;  %v5717_v47 = vld [vmem:[#allocation5 + $0x888] ss:$16 sps:$4 sm:$0xff]   ;;  %v5718_v48 = vld [vmem:[#allocation5 + $0x8a4] ss:$16 sps:$4 sm:$0xff]  }
 0x110   :  { %3673 = vmatpush1.bf16.msra.mxu0 %v5629_v50  ;;  %4273 = vmatpush1.bf16.msra.mxu1 %v5632_v51  ;;  %v5721_v50 = vld [vmem:[#allocation5 + $0x8ac] ss:$16 sps:$4 sm:$0xff]   ;;  %v5720_v51 = vld [vmem:[#allocation5 + $0x8a0] ss:$16 sps:$4 sm:$0xff]  }
 0x111   :  { %3675 = vmatprep.subr.bf16.mxu0 %v5633_v52  ;;  %4275 = vmatprep.subr.bf16.mxu1 %v5636_v53  ;;  %v5723_v52 = vld [vmem:[#allocation5 + $0x8a8] ss:$16 sps:$4 sm:$0xff]   ;;  %v5724_v53 = vld [vmem:[#allocation5 + $0x8c4] ss:$16 sps:$4 sm:$0xff]  }
 0x114   :  { %3677 = vmatpush1.bf16.msra.mxu0 %v5635_v54  ;;  %4277 = vmatpush1.bf16.msra.mxu1 %v5638_v55  ;;  %v5727_v54 = vld [vmem:[#allocation5 + $0x8cc] ss:$16 sps:$4 sm:$0xff]   ;;  %v5726_v55 = vld [vmem:[#allocation5 + $0x8c0] ss:$16 sps:$4 sm:$0xff]  }
 0x115   :  { %3679 = vmatprep.subr.bf16.mxu0 %v5639_v56  ;;  %4279 = vmatprep.subr.bf16.mxu1 %v5642_v57  ;;  %v5729_v56 = vld [vmem:[#allocation5 + $0x8c8] ss:$16 sps:$4 sm:$0xff]   ;;  %v5730_v57 = vld [vmem:[#allocation5 + $0x8e4] ss:$16 sps:$4 sm:$0xff]  }
 0x118   :  { %3681 = vmatpush1.bf16.msra.mxu0 %v5641_v58  ;;  %4281 = vmatpush1.bf16.msra.mxu1 %v5644_v59  ;;  %v5733_v58 = vld [vmem:[#allocation5 + $0x8ec] ss:$16 sps:$4 sm:$0xff]   ;;  %v5732_v59 = vld [vmem:[#allocation5 + $0x8e0] ss:$16 sps:$4 sm:$0xff]  }
 0x119   :  { %3683 = vmatprep.subr.bf16.mxu0 %v5645_v60  ;;  %4283 = vmatprep.subr.bf16.mxu1 %v5648_v61  ;;  %v5735_v60 = vld [vmem:[#allocation5 + $0x8e8] ss:$16 sps:$4 sm:$0xff]   ;;  %v5736_v61 = vld [vmem:[#allocation5 + $0x904] ss:$16 sps:$4 sm:$0xff]  }
 0x11c   :  { %3685 = vmatpush1.bf16.msra.mxu0 %v5647_v62  ;;  %4285 = vmatpush1.bf16.msra.mxu1 %v5650_v63  ;;  %v5739_v62 = vld [vmem:[#allocation5 + $0x90c] ss:$16 sps:$4 sm:$0xff]   ;;  %v5738_v63 = vld [vmem:[#allocation5 + $0x900] ss:$16 sps:$4 sm:$0xff]  }
 0x11d   :  { %3687 = vmatprep.subr.bf16.mxu0 %v5651_v0  ;;  %4287 = vmatprep.subr.bf16.mxu1 %v5654_v1  ;;  %v5741_v0 = vld [vmem:[#allocation5 + $0x908] ss:$16 sps:$4 sm:$0xff]   ;;  %v5742_v1 = vld [vmem:[#allocation5 + $0x924] ss:$16 sps:$4 sm:$0xff]  }
 0x120   :  { %3689 = vmatpush1.bf16.msra.mxu0 %v5653_v2  ;;  %4289 = vmatpush1.bf16.msra.mxu1 %v5656_v3  ;;  %v5745_v2 = vld [vmem:[#allocation5 + $0x92c] ss:$16 sps:$4 sm:$0xff]   ;;  %v5744_v3 = vld [vmem:[#allocation5 + $0x920] ss:$16 sps:$4 sm:$0xff]  }
 0x121   :  { %3691 = vmatprep.subr.bf16.mxu0 %v5657_v4  ;;  %4291 = vmatprep.subr.bf16.mxu1 %v5660_v5  ;;  %v5747_v4 = vld [vmem:[#allocation5 + $0x928] ss:$16 sps:$4 sm:$0xff]   ;;  %v5748_v5 = vld [vmem:[#allocation5 + $0x944] ss:$16 sps:$4 sm:$0xff]  }
 0x124   :  { %3693 = vmatpush1.bf16.msra.mxu0 %v5659_v6  ;;  %4293 = vmatpush1.bf16.msra.mxu1 %v5662_v7  ;;  %v5751_v6 = vld [vmem:[#allocation5 + $0x94c] ss:$16 sps:$4 sm:$0xff]   ;;  %v5750_v7 = vld [vmem:[#allocation5 + $0x940] ss:$16 sps:$4 sm:$0xff]  }
 0x125   :  { %3695 = vmatprep.subr.bf16.mxu0 %v5663_v8  ;;  %4295 = vmatprep.subr.bf16.mxu1 %v5666_v9  ;;  %v5753_v8 = vld [vmem:[#allocation5 + $0x948] ss:$16 sps:$4 sm:$0xff]   ;;  %v5754_v9 = vld [vmem:[#allocation5 + $0x964] ss:$16 sps:$4 sm:$0xff]  }
 0x128   :  { %3697 = vmatpush1.bf16.msra.mxu0 %v5665_v10  ;;  %4297 = vmatpush1.bf16.msra.mxu1 %v5668_v11  ;;  %v5757_v10 = vld [vmem:[#allocation5 + $0x96c] ss:$16 sps:$4 sm:$0xff]   ;;  %v5756_v11 = vld [vmem:[#allocation5 + $0x960] ss:$16 sps:$4 sm:$0xff]  }
 0x129   :  { %3699 = vmatprep.subr.bf16.mxu0 %v5669_v13  ;;  %4299 = vmatprep.subr.bf16.mxu1 %v5672_v14  ;;  %v5759_v13 = vld [vmem:[#allocation5 + $0x968] ss:$16 sps:$4 sm:$0xff]   ;;  %v5760_v14 = vld [vmem:[#allocation5 + $0x984] ss:$16 sps:$4 sm:$0xff]  }
 0x12c   :  { %3701 = vmatpush1.bf16.msra.mxu0 %v5671_v15  ;;  %4301 = vmatpush1.bf16.msra.mxu1 %v5674_v16  ;;  %v5763_v15 = vld [vmem:[#allocation5 + $0x98c] ss:$16 sps:$4 sm:$0xff]   ;;  %v5762_v16 = vld [vmem:[#allocation5 + $0x980] ss:$16 sps:$4 sm:$0xff]  }
 0x12d   :  { %3703 = vmatprep.subr.bf16.mxu0 %v5675_v17  ;;  %4303 = vmatprep.subr.bf16.mxu1 %v5678_v18  ;;  %v5765_v17 = vld [vmem:[#allocation5 + $0x988] ss:$16 sps:$4 sm:$0xff]   ;;  %v5766_v18 = vld [vmem:[#allocation5 + $0x9a4] ss:$16 sps:$4 sm:$0xff]  }
 0x130   :  { %3705 = vmatpush1.bf16.msra.mxu0 %v5677_v20  ;;  %4305 = vmatpush1.bf16.msra.mxu1 %v5680_v21  ;;  %v5769_v20 = vld [vmem:[#allocation5 + $0x9ac] ss:$16 sps:$4 sm:$0xff]   ;;  %v5768_v21 = vld [vmem:[#allocation5 + $0x9a0] ss:$16 sps:$4 sm:$0xff]  }
 0x131   :  { %3707 = vmatprep.subr.bf16.mxu0 %v5681_v23  ;;  %4307 = vmatprep.subr.bf16.mxu1 %v5684_v24  ;;  %v5771_v23 = vld [vmem:[#allocation5 + $0x9a8] ss:$16 sps:$4 sm:$0xff]   ;;  %v5772_v24 = vld [vmem:[#allocation5 + $0x9c4] ss:$16 sps:$4 sm:$0xff]  }
 0x134   :  { %3709 = vmatpush1.bf16.msra.mxu0 %v5683_v26  ;;  %4309 = vmatpush1.bf16.msra.mxu1 %v5686_v28  ;;  %v5775_v26 = vld [vmem:[#allocation5 + $0x9cc] ss:$16 sps:$4 sm:$0xff]   ;;  %v5774_v28 = vld [vmem:[#allocation5 + $0x9c0] ss:$16 sps:$4 sm:$0xff]  }
 0x135   :  { %3711 = vmatprep.subr.bf16.mxu0 %v5688_v29  ;;  %4311 = vmatprep.subr.bf16.mxu1 %v5691_v19  ;;  %v5777_v29 = vld [vmem:[#allocation5 + $0x9c8] ss:$16 sps:$4 sm:$0xff]   ;;  %v5778_v19 = vld [vmem:[#allocation5 + $0x9e4] ss:$16 sps:$4 sm:$0xff]  }
 0x137   :  { %2267 = vmatmul.mubr.f32.vlgmr.msra.gmra.mrb[0].mxu0 %v6389_v25  ;;  %2977 = vmatmul.mubr.f32.vlgmr.msra.gmra.mrb[0].mxu1 %v6389_v25  ;;  %v5711_v25 = vld [vmem:[#allocation5 + $0x868] ss:$16 sps:$4 sm:$0xff]  }
 0x138   :  { %3713 = vmatpush1.bf16.msra.mxu0 %v5690_v30  ;;  %4313 = vmatpush1.bf16.msra.mxu1 %v5693_v31  ;;  %v5781_v30 = vld [vmem:[#allocation5 + $0x9ec] ss:$16 sps:$4 sm:$0xff]   ;;  %v5780_v31 = vld [vmem:[#allocation5 + $0x9e0] ss:$16 sps:$4 sm:$0xff]  }
 0x139   :  { %3715 = vmatprep.subr.bf16.mxu0 %v5694_v32  ;;  %4315 = vmatprep.subr.bf16.mxu1 %v5697_v33  ;;  %v1918_v32 = vcombine.high %v6395_v27, %v6395_v27  ;;  %v5783_v33 = vld [vmem:[#allocation5 + $0x9e8] ss:$16 sps:$4 sm:$0xff]  }
 0x13a   :  { %2337 = vmatprep.mubr.f32.mxu0 %v1933_v34  ;;  %3047 = vmatprep.mubr.f32.mxu1 %v1933_v34  ;;  %v5784_v34 = vld [vmem:[#allocation5 + $0xa04] ss:$16 sps:$4 sm:$0xff]  }
 0x13c   :  { %3717 = vmatpush1.bf16.msra.mxu0 %v5696_v35  ;;  %4317 = vmatpush1.bf16.msra.mxu1 %v5699_v36  ;;  %v5787_v35 = vld [vmem:[#allocation5 + $0xa0c] ss:$16 sps:$4 sm:$0xff]   ;;  %v5786_v36 = vld [vmem:[#allocation5 + $0xa00] ss:$16 sps:$4 sm:$0xff]  }
 0x13d   :  { %3719 = vmatprep.subr.bf16.mxu0 %v5700_v22  ;;  %4319 = vmatprep.subr.bf16.mxu1 %v5703_v37  ;;  %v6408_v22 = vrot.slane %v1918_v32, %v6368_v49  ;;  %v5789_v37 = vld [vmem:[#allocation5 + $0xa08] ss:$16 sps:$4 sm:$0xff]   ;;  %v5870_v32 = vld [vmem:[#allocation5 + $0xbc0] ss:$16 sps:$4 sm:$0xff]  }
 0x13f   :  { %v1934_v27 = vcombine.high %v6408_v22, %v6408_v22 }
 0x140   :  { %3721 = vmatpush1.bf16.msra.mxu0 %v5702_v38  ;;  %4321 = vmatpush1.bf16.msra.mxu1 %v5705_v39  ;;  %v5790_v38 = vld [vmem:[#allocation5 + $0xa24] ss:$16 sps:$4 sm:$0xff]   ;;  %v5793_v39 = vld [vmem:[#allocation5 + $0xa2c] ss:$16 sps:$4 sm:$0xff]  }
 0x141   :  { %3723 = vmatprep.subr.bf16.mxu0 %v5706_v40  ;;  %4323 = vmatprep.subr.bf16.mxu1 %v5709_v41  ;;  %v5792_v40 = vld [vmem:[#allocation5 + $0xa20] ss:$16 sps:$4 sm:$0xff]   ;;  %v5795_v41 = vld [vmem:[#allocation5 + $0xa28] ss:$16 sps:$4 sm:$0xff]  }
 0x144   :  { %3725 = vmatpush1.bf16.msra.mxu0 %v5708_v43  ;;  %4325 = vmatpush1.bf16.msra.mxu1 %v5711_v25  ;;  %v5796_v43 = vld [vmem:[#allocation5 + $0xa44] ss:$16 sps:$4 sm:$0xff]   ;;  %v5799_v25 = vld [vmem:[#allocation5 + $0xa4c] ss:$16 sps:$4 sm:$0xff]  }
 0x145   :  { %3727 = vmatprep.subr.bf16.mxu0 %v5712_v44  ;;  %4327 = vmatprep.subr.bf16.mxu1 %v5715_v45  ;;  %v5798_v44 = vld [vmem:[#allocation5 + $0xa40] ss:$16 sps:$4 sm:$0xff]   ;;  %v5801_v45 = vld [vmem:[#allocation5 + $0xa48] ss:$16 sps:$4 sm:$0xff]  }
 0x148   :  { %3729 = vmatpush1.bf16.msra.mxu0 %v5714_v46  ;;  %4329 = vmatpush1.bf16.msra.mxu1 %v5717_v47  ;;  %v5802_v46 = vld [vmem:[#allocation5 + $0xa64] ss:$16 sps:$4 sm:$0xff]   ;;  %v5805_v47 = vld [vmem:[#allocation5 + $0xa6c] ss:$16 sps:$4 sm:$0xff]  }
 0x149   :  { %3731 = vmatprep.subr.bf16.mxu0 %v5718_v48  ;;  %4331 = vmatprep.subr.bf16.mxu1 %v5721_v50  ;;  %v5804_v48 = vld [vmem:[#allocation5 + $0xa60] ss:$16 sps:$4 sm:$0xff]   ;;  %v5808_v50 = vld [vmem:[#allocation5 + $0xa84] ss:$16 sps:$4 sm:$0xff]  }
 0x14c   :  { %3733 = vmatpush1.bf16.msra.mxu0 %v5720_v51  ;;  %4333 = vmatpush1.bf16.msra.mxu1 %v5723_v52  ;;  %v5811_v51 = vld [vmem:[#allocation5 + $0xa8c] ss:$16 sps:$4 sm:$0xff]   ;;  %v5810_v52 = vld [vmem:[#allocation5 + $0xa80] ss:$16 sps:$4 sm:$0xff]  }
 0x14d   :  { %3735 = vmatprep.subr.bf16.mxu0 %v5724_v53  ;;  %4335 = vmatprep.subr.bf16.mxu1 %v5727_v54  ;;  %v5813_v53 = vld [vmem:[#allocation5 + $0xa88] ss:$16 sps:$4 sm:$0xff]   ;;  %v5814_v54 = vld [vmem:[#allocation5 + $0xaa4] ss:$16 sps:$4 sm:$0xff]  }
 0x150   :  { %3737 = vmatpush1.bf16.msra.mxu0 %v5726_v55  ;;  %4337 = vmatpush1.bf16.msra.mxu1 %v5729_v56  ;;  %v5817_v55 = vld [vmem:[#allocation5 + $0xaac] ss:$16 sps:$4 sm:$0xff]   ;;  %v5816_v56 = vld [vmem:[#allocation5 + $0xaa0] ss:$16 sps:$4 sm:$0xff]  }
 0x151   :  { %3739 = vmatprep.subr.bf16.mxu0 %v5730_v57  ;;  %4339 = vmatprep.subr.bf16.mxu1 %v5733_v58  ;;  %v5819_v57 = vld [vmem:[#allocation5 + $0xaa8] ss:$16 sps:$4 sm:$0xff]   ;;  %v5820_v58 = vld [vmem:[#allocation5 + $0xac4] ss:$16 sps:$4 sm:$0xff]  }
 0x154   :  { %3741 = vmatpush1.bf16.msra.mxu0 %v5732_v59  ;;  %4341 = vmatpush1.bf16.msra.mxu1 %v5735_v60  ;;  %v5823_v59 = vld [vmem:[#allocation5 + $0xacc] ss:$16 sps:$4 sm:$0xff]   ;;  %v5822_v60 = vld [vmem:[#allocation5 + $0xac0] ss:$16 sps:$4 sm:$0xff]  }
 0x155   :  { %3743 = vmatprep.subr.bf16.mxu0 %v5736_v61  ;;  %4343 = vmatprep.subr.bf16.mxu1 %v5739_v62  ;;  %v5825_v61 = vld [vmem:[#allocation5 + $0xac8] ss:$16 sps:$4 sm:$0xff]   ;;  %v5826_v62 = vld [vmem:[#allocation5 + $0xae4] ss:$16 sps:$4 sm:$0xff]  }
 0x158   :  { %3745 = vmatpush1.bf16.msra.mxu0 %v5738_v63  ;;  %4345 = vmatpush1.bf16.msra.mxu1 %v5741_v0  ;;  %v5829_v63 = vld [vmem:[#allocation5 + $0xaec] ss:$16 sps:$4 sm:$0xff]   ;;  %v5828_v0 = vld [vmem:[#allocation5 + $0xae0] ss:$16 sps:$4 sm:$0xff]  }
 0x159   :  { %3747 = vmatprep.subr.bf16.mxu0 %v5742_v1  ;;  %4347 = vmatprep.subr.bf16.mxu1 %v5745_v2  ;;  %v5831_v1 = vld [vmem:[#allocation5 + $0xae8] ss:$16 sps:$4 sm:$0xff]   ;;  %v5832_v2 = vld [vmem:[#allocation5 + $0xb04] ss:$16 sps:$4 sm:$0xff]  }
 0x15c   :  { %3749 = vmatpush1.bf16.msra.mxu0 %v5744_v3  ;;  %4349 = vmatpush1.bf16.msra.mxu1 %v5747_v4  ;;  %v5835_v3 = vld [vmem:[#allocation5 + $0xb0c] ss:$16 sps:$4 sm:$0xff]   ;;  %v5834_v4 = vld [vmem:[#allocation5 + $0xb00] ss:$16 sps:$4 sm:$0xff]  }
 0x15d   :  { %3751 = vmatprep.subr.bf16.mxu0 %v5748_v5  ;;  %4351 = vmatprep.subr.bf16.mxu1 %v5751_v6  ;;  %v5837_v5 = vld [vmem:[#allocation5 + $0xb08] ss:$16 sps:$4 sm:$0xff]   ;;  %v5838_v6 = vld [vmem:[#allocation5 + $0xb24] ss:$16 sps:$4 sm:$0xff]  }
 0x160   :  { %3753 = vmatpush1.bf16.msra.mxu0 %v5750_v7  ;;  %4353 = vmatpush1.bf16.msra.mxu1 %v5753_v8  ;;  %v5841_v7 = vld [vmem:[#allocation5 + $0xb2c] ss:$16 sps:$4 sm:$0xff]   ;;  %v5840_v8 = vld [vmem:[#allocation5 + $0xb20] ss:$16 sps:$4 sm:$0xff]  }
 0x161   :  { %3755 = vmatprep.subr.bf16.mxu0 %v5754_v9  ;;  %4355 = vmatprep.subr.bf16.mxu1 %v5757_v10  ;;  %v5843_v9 = vld [vmem:[#allocation5 + $0xb28] ss:$16 sps:$4 sm:$0xff]   ;;  %v5844_v10 = vld [vmem:[#allocation5 + $0xb44] ss:$16 sps:$4 sm:$0xff]  }
 0x164   :  { %3757 = vmatpush1.bf16.msra.mxu0 %v5756_v11  ;;  %4357 = vmatpush1.bf16.msra.mxu1 %v5759_v13  ;;  %v5847_v11 = vld [vmem:[#allocation5 + $0xb4c] ss:$16 sps:$4 sm:$0xff]   ;;  %v5846_v13 = vld [vmem:[#allocation5 + $0xb40] ss:$16 sps:$4 sm:$0xff]  }
 0x165   :  { %3759 = vmatprep.subr.bf16.mxu0 %v5760_v14  ;;  %4359 = vmatprep.subr.bf16.mxu1 %v5763_v15  ;;  %v5849_v14 = vld [vmem:[#allocation5 + $0xb48] ss:$16 sps:$4 sm:$0xff]   ;;  %v5850_v15 = vld [vmem:[#allocation5 + $0xb64] ss:$16 sps:$4 sm:$0xff]  }
 0x168   :  { %3761 = vmatpush1.bf16.msra.mxu0 %v5762_v16  ;;  %4361 = vmatpush1.bf16.msra.mxu1 %v5765_v17  ;;  %v5853_v16 = vld [vmem:[#allocation5 + $0xb6c] ss:$16 sps:$4 sm:$0xff]   ;;  %v5852_v17 = vld [vmem:[#allocation5 + $0xb60] ss:$16 sps:$4 sm:$0xff]  }
 0x169   :  { %3763 = vmatprep.subr.bf16.mxu0 %v5766_v18  ;;  %4363 = vmatprep.subr.bf16.mxu1 %v5769_v20  ;;  %v5855_v18 = vld [vmem:[#allocation5 + $0xb68] ss:$16 sps:$4 sm:$0xff]   ;;  %v5856_v20 = vld [vmem:[#allocation5 + $0xb84] ss:$16 sps:$4 sm:$0xff]  }
 0x16c   :  { %3765 = vmatpush1.bf16.msra.mxu0 %v5768_v21  ;;  %4365 = vmatpush1.bf16.msra.mxu1 %v5771_v23  ;;  %v5859_v21 = vld [vmem:[#allocation5 + $0xb8c] ss:$16 sps:$4 sm:$0xff]   ;;  %v5858_v23 = vld [vmem:[#allocation5 + $0xb80] ss:$16 sps:$4 sm:$0xff]  }
 0x16d   :  { %3767 = vmatprep.subr.bf16.mxu0 %v5772_v24  ;;  %4367 = vmatprep.subr.bf16.mxu1 %v5775_v26  ;;  %v5861_v24 = vld [vmem:[#allocation5 + $0xb88] ss:$16 sps:$4 sm:$0xff]   ;;  %v5862_v26 = vld [vmem:[#allocation5 + $0xba4] ss:$16 sps:$4 sm:$0xff]  }
 0x170   :  { %3769 = vmatpush1.bf16.msra.mxu0 %v5774_v28  ;;  %4369 = vmatpush1.bf16.msra.mxu1 %v5777_v29  ;;  %v5865_v28 = vld [vmem:[#allocation5 + $0xbac] ss:$16 sps:$4 sm:$0xff]   ;;  %v5864_v29 = vld [vmem:[#allocation5 + $0xba0] ss:$16 sps:$4 sm:$0xff]  }
 0x171   :  { %3771 = vmatprep.subr.bf16.mxu0 %v5778_v19  ;;  %4371 = vmatprep.subr.bf16.mxu1 %v5781_v30  ;;  %v5867_v19 = vld [vmem:[#allocation5 + $0xba8] ss:$16 sps:$4 sm:$0xff]   ;;  %v5868_v30 = vld [vmem:[#allocation5 + $0xbc4] ss:$16 sps:$4 sm:$0xff]  }
 0x174   :  { %3773 = vmatpush1.bf16.msra.mxu0 %v5780_v31  ;;  %4373 = vmatpush1.bf16.msra.mxu1 %v5783_v33  ;;  %v5871_v31 = vld [vmem:[#allocation5 + $0xbcc] ss:$16 sps:$4 sm:$0xff]   ;;  %v5873_v33 = vld [vmem:[#allocation5 + $0xbc8] ss:$16 sps:$4 sm:$0xff]  }
 0x175   :  { %3775 = vmatprep.subr.bf16.mxu0 %v5784_v34  ;;  %4375 = vmatprep.subr.bf16.mxu1 %v5787_v35  ;;  %v5874_v34 = vld [vmem:[#allocation5 + $0xbe4] ss:$16 sps:$4 sm:$0xff]   ;;  %v5877_v35 = vld [vmem:[#allocation5 + $0xbec] ss:$16 sps:$4 sm:$0xff]  }
 0x177   :  { %2338 = vmatmul.mubr.f32.vlgmr.msra.gmra.mrb[0].mxu0 %v6399_v12  ;;  %3048 = vmatmul.mubr.f32.vlgmr.msra.gmra.mrb[0].mxu1 %v6399_v12  ;;  %v5807_v12 = vld [vmem:[#allocation5 + $0xa68] ss:$16 sps:$4 sm:$0xff]  }
 0x178   :  { %3777 = vmatpush1.bf16.msra.mxu0 %v5786_v36  ;;  %4377 = vmatpush1.bf16.msra.mxu1 %v5789_v37  ;;  %v6414_v36 = vld [vmem:[#allocation2 + $0x18] sm:$0xff] }
 0x179   :  { %3779 = vmatprep.subr.bf16.mxu0 %v5790_v38  ;;  %4379 = vmatprep.subr.bf16.mxu1 %v5793_v39  ;;  %v5876_v37 = vld [vmem:[#allocation5 + $0xbe0] ss:$16 sps:$4 sm:$0xff]   ;;  %v5879_v38 = vld [vmem:[#allocation5 + $0xbe8] ss:$16 sps:$4 sm:$0xff]   ;;  %v5881_v39 = vld [vmem:[#allocation5 + $0xc04] ss:$16 sps:$4 sm:$0xff]  }
 0x17a   :  { %2408 = vmatprep.mubr.f32.mxu0 %v1934_v27  ;;  %3118 = vmatprep.mubr.f32.mxu1 %v1934_v27  ;;  %v6418_v27 = vrot.slane %v6414_v36, %v6368_v49 }
 0x17c   :  { %3781 = vmatpush1.bf16.msra.mxu0 %v5792_v40  ;;  %4381 = vmatpush1.bf16.msra.mxu1 %v5795_v41  ;;  %v5884_v40 = vld [vmem:[#allocation5 + $0xc0c] ss:$16 sps:$4 sm:$0xff]   ;;  %v5883_v41 = vld [vmem:[#allocation5 + $0xc00] ss:$16 sps:$4 sm:$0xff]  }
 0x17d   :  { %3783 = vmatprep.subr.bf16.mxu0 %v5796_v43  ;;  %4383 = vmatprep.subr.bf16.mxu1 %v5799_v25  ;;  %v5886_v43 = vld [vmem:[#allocation5 + $0xc08] ss:$16 sps:$4 sm:$0xff]   ;;  %v5887_v25 = vld [vmem:[#allocation5 + $0xc24] ss:$16 sps:$4 sm:$0xff]  }
 0x180   :  { %3785 = vmatpush1.bf16.msra.mxu0 %v5798_v44  ;;  %4385 = vmatpush1.bf16.msra.mxu1 %v5801_v45  ;;  %v5890_v44 = vld [vmem:[#allocation5 + $0xc2c] ss:$16 sps:$4 sm:$0xff]   ;;  %v1950_v45 = vcombine.high %v6418_v27, %v6418_v27 }
 0x181   :  { %3787 = vmatprep.subr.bf16.mxu0 %v5802_v46  ;;  %4387 = vmatprep.subr.bf16.mxu1 %v5805_v47  ;;  %v5889_v46 = vld [vmem:[#allocation5 + $0xc20] ss:$16 sps:$4 sm:$0xff]   ;;  %v5892_v47 = vld [vmem:[#allocation5 + $0xc28] ss:$16 sps:$4 sm:$0xff]  }
 0x184   :  { %3789 = vmatpush1.bf16.msra.mxu0 %v5804_v48  ;;  %4389 = vmatpush1.bf16.msra.mxu1 %v5807_v12  ;;  %v5893_v48 = vld [vmem:[#allocation5 + $0xc44] ss:$16 sps:$4 sm:$0xff]   ;;  %v5896_v12 = vld [vmem:[#allocation5 + $0xc4c] ss:$16 sps:$4 sm:$0xff]  }
 0x185   :  { %3791 = vmatprep.subr.bf16.mxu0 %v5808_v50  ;;  %4391 = vmatprep.subr.bf16.mxu1 %v5811_v51  ;;  %v5895_v50 = vld [vmem:[#allocation5 + $0xc40] ss:$16 sps:$4 sm:$0xff]   ;;  %v5898_v51 = vld [vmem:[#allocation5 + $0xc48] ss:$16 sps:$4 sm:$0xff]  }
 0x188   :  { %3793 = vmatpush1.bf16.msra.mxu0 %v5810_v52  ;;  %4393 = vmatpush1.bf16.msra.mxu1 %v5813_v53  ;;  %v5899_v52 = vld [vmem:[#allocation5 + $0xc64] ss:$16 sps:$4 sm:$0xff]   ;;  %v5902_v53 = vld [vmem:[#allocation5 + $0xc6c] ss:$16 sps:$4 sm:$0xff]  }
 0x189   :  { %3795 = vmatprep.subr.bf16.mxu0 %v5814_v54  ;;  %4395 = vmatprep.subr.bf16.mxu1 %v5817_v55  ;;  %v5904_v54 = vld [vmem:[#allocation5 + $0xc68] ss:$16 sps:$4 sm:$0xff]   ;;  %v5905_v55 = vld [vmem:[#allocation5 + $0xc84] ss:$16 sps:$4 sm:$0xff]  }
 0x18c   :  { %3797 = vmatpush1.bf16.msra.mxu0 %v5816_v56  ;;  %4397 = vmatpush1.bf16.msra.mxu1 %v5819_v57  ;;  %v5908_v56 = vld [vmem:[#allocation5 + $0xc8c] ss:$16 sps:$4 sm:$0xff]   ;;  %v5907_v57 = vld [vmem:[#allocation5 + $0xc80] ss:$16 sps:$4 sm:$0xff]  }
 0x18d   :  { %3799 = vmatprep.subr.bf16.mxu0 %v5820_v58  ;;  %4399 = vmatprep.subr.bf16.mxu1 %v5823_v59  ;;  %v5910_v58 = vld [vmem:[#allocation5 + $0xc88] ss:$16 sps:$4 sm:$0xff]   ;;  %v5911_v59 = vld [vmem:[#allocation5 + $0xca4] ss:$16 sps:$4 sm:$0xff]  }
 0x190   :  { %3801 = vmatpush1.bf16.msra.mxu0 %v5822_v60  ;;  %4401 = vmatpush1.bf16.msra.mxu1 %v5825_v61  ;;  %v5914_v60 = vld [vmem:[#allocation5 + $0xcac] ss:$16 sps:$4 sm:$0xff]   ;;  %v5913_v61 = vld [vmem:[#allocation5 + $0xca0] ss:$16 sps:$4 sm:$0xff]  }
 0x191   :  { %3803 = vmatprep.subr.bf16.mxu0 %v5826_v62  ;;  %4403 = vmatprep.subr.bf16.mxu1 %v5829_v63  ;;  %v5916_v62 = vld [vmem:[#allocation5 + $0xca8] ss:$16 sps:$4 sm:$0xff]   ;;  %v5917_v63 = vld [vmem:[#allocation5 + $0xcc4] ss:$16 sps:$4 sm:$0xff]  }
 0x194   :  { %3805 = vmatpush1.bf16.msra.mxu0 %v5828_v0  ;;  %4405 = vmatpush1.bf16.msra.mxu1 %v5831_v1  ;;  %v5920_v0 = vld [vmem:[#allocation5 + $0xccc] ss:$16 sps:$4 sm:$0xff]   ;;  %v5919_v1 = vld [vmem:[#allocation5 + $0xcc0] ss:$16 sps:$4 sm:$0xff]  }
 0x195   :  { %3807 = vmatprep.subr.bf16.mxu0 %v5832_v2  ;;  %4407 = vmatprep.subr.bf16.mxu1 %v5835_v3  ;;  %v5922_v2 = vld [vmem:[#allocation5 + $0xcc8] ss:$16 sps:$4 sm:$0xff]   ;;  %v5923_v3 = vld [vmem:[#allocation5 + $0xce4] ss:$16 sps:$4 sm:$0xff]  }
 0x198   :  { %3809 = vmatpush1.bf16.msra.mxu0 %v5834_v4  ;;  %4409 = vmatpush1.bf16.msra.mxu1 %v5837_v5  ;;  %v5926_v4 = vld [vmem:[#allocation5 + $0xcec] ss:$16 sps:$4 sm:$0xff]   ;;  %v5925_v5 = vld [vmem:[#allocation5 + $0xce0] ss:$16 sps:$4 sm:$0xff]  }
 0x199   :  { %3811 = vmatprep.subr.bf16.mxu0 %v5838_v6  ;;  %4411 = vmatprep.subr.bf16.mxu1 %v5841_v7  ;;  %v5928_v6 = vld [vmem:[#allocation5 + $0xce8] ss:$16 sps:$4 sm:$0xff]   ;;  %v5929_v7 = vld [vmem:[#allocation5 + $0xd04] ss:$16 sps:$4 sm:$0xff]  }
 0x19c   :  { %3813 = vmatpush1.bf16.msra.mxu0 %v5840_v8  ;;  %4413 = vmatpush1.bf16.msra.mxu1 %v5843_v9  ;;  %v5932_v8 = vld [vmem:[#allocation5 + $0xd0c] ss:$16 sps:$4 sm:$0xff]   ;;  %v5931_v9 = vld [vmem:[#allocation5 + $0xd00] ss:$16 sps:$4 sm:$0xff]  }
 0x19d   :  { %3815 = vmatprep.subr.bf16.mxu0 %v5844_v10  ;;  %4415 = vmatprep.subr.bf16.mxu1 %v5847_v11  ;;  %v5934_v10 = vld [vmem:[#allocation5 + $0xd08] ss:$16 sps:$4 sm:$0xff]   ;;  %v5935_v11 = vld [vmem:[#allocation5 + $0xd24] ss:$16 sps:$4 sm:$0xff]  }
 0x1a0   :  { %3817 = vmatpush1.bf16.msra.mxu0 %v5846_v13  ;;  %4417 = vmatpush1.bf16.msra.mxu1 %v5849_v14  ;;  %v5938_v13 = vld [vmem:[#allocation5 + $0xd2c] ss:$16 sps:$4 sm:$0xff]   ;;  %v5937_v14 = vld [vmem:[#allocation5 + $0xd20] ss:$16 sps:$4 sm:$0xff]  }
 0x1a1   :  { %3819 = vmatprep.subr.bf16.mxu0 %v5850_v15  ;;  %4419 = vmatprep.subr.bf16.mxu1 %v5853_v16  ;;  %v5940_v15 = vld [vmem:[#allocation5 + $0xd28] ss:$16 sps:$4 sm:$0xff]   ;;  %v5941_v16 = vld [vmem:[#allocation5 + $0xd44] ss:$16 sps:$4 sm:$0xff]  }
 0x1a4   :  { %3821 = vmatpush1.bf16.msra.mxu0 %v5852_v17  ;;  %4421 = vmatpush1.bf16.msra.mxu1 %v5855_v18  ;;  %v5944_v17 = vld [vmem:[#allocation5 + $0xd4c] ss:$16 sps:$4 sm:$0xff]   ;;  %v5943_v18 = vld [vmem:[#allocation5 + $0xd40] ss:$16 sps:$4 sm:$0xff]  }
 0x1a5   :  { %3823 = vmatprep.subr.bf16.mxu0 %v5856_v20  ;;  %4423 = vmatprep.subr.bf16.mxu1 %v5859_v21  ;;  %v5946_v20 = vld [vmem:[#allocation5 + $0xd48] ss:$16 sps:$4 sm:$0xff]   ;;  %v5947_v21 = vld [vmem:[#allocation5 + $0xd64] ss:$16 sps:$4 sm:$0xff]  }
 0x1a8   :  { %3825 = vmatpush1.bf16.msra.mxu0 %v5858_v23  ;;  %4425 = vmatpush1.bf16.msra.mxu1 %v5861_v24  ;;  %v5950_v23 = vld [vmem:[#allocation5 + $0xd6c] ss:$16 sps:$4 sm:$0xff]   ;;  %v5949_v24 = vld [vmem:[#allocation5 + $0xd60] ss:$16 sps:$4 sm:$0xff]  }
 0x1a9   :  { %3827 = vmatprep.subr.bf16.mxu0 %v5862_v26  ;;  %4427 = vmatprep.subr.bf16.mxu1 %v5865_v28  ;;  %v5952_v26 = vld [vmem:[#allocation5 + $0xd68] ss:$16 sps:$4 sm:$0xff]   ;;  %v5953_v28 = vld [vmem:[#allocation5 + $0xd84] ss:$16 sps:$4 sm:$0xff]  }
 0x1ac   :  { %3829 = vmatpush1.bf16.msra.mxu0 %v5864_v29  ;;  %4429 = vmatpush1.bf16.msra.mxu1 %v5867_v19  ;;  %v5956_v29 = vld [vmem:[#allocation5 + $0xd8c] ss:$16 sps:$4 sm:$0xff]   ;;  %v5955_v19 = vld [vmem:[#allocation5 + $0xd80] ss:$16 sps:$4 sm:$0xff]  }
 0x1ad   :  { %3831 = vmatprep.subr.bf16.mxu0 %v5868_v30  ;;  %4431 = vmatprep.subr.bf16.mxu1 %v5871_v31  ;;  %v5958_v30 = vld [vmem:[#allocation5 + $0xd88] ss:$16 sps:$4 sm:$0xff]   ;;  %v5959_v31 = vld [vmem:[#allocation5 + $0xda4] ss:$16 sps:$4 sm:$0xff]  }
 0x1b0   :  { %3833 = vmatpush1.bf16.msra.mxu0 %v5870_v32  ;;  %4433 = vmatpush1.bf16.msra.mxu1 %v5873_v33  ;;  %v5962_v32 = vld [vmem:[#allocation5 + $0xdac] ss:$16 sps:$4 sm:$0xff]   ;;  %v5961_v33 = vld [vmem:[#allocation5 + $0xda0] ss:$16 sps:$4 sm:$0xff]  }
 0x1b1   :  { %3835 = vmatprep.subr.bf16.mxu0 %v5874_v34  ;;  %4435 = vmatprep.subr.bf16.mxu1 %v5877_v35  ;;  %v5964_v34 = vld [vmem:[#allocation5 + $0xda8] ss:$16 sps:$4 sm:$0xff]   ;;  %v5965_v35 = vld [vmem:[#allocation5 + $0xdc4] ss:$16 sps:$4 sm:$0xff]  }
 0x1b4   :  { %3837 = vmatpush1.bf16.msra.mxu0 %v5876_v37  ;;  %4437 = vmatpush1.bf16.msra.mxu1 %v5879_v38  ;;  %v5968_v37 = vld [vmem:[#allocation5 + $0xdcc] ss:$16 sps:$4 sm:$0xff]   ;;  %v5967_v38 = vld [vmem:[#allocation5 + $0xdc0] ss:$16 sps:$4 sm:$0xff]  }
 0x1b5   :  { %3839 = vmatprep.subr.bf16.mxu0 %v5881_v39  ;;  %4439 = vmatprep.subr.bf16.mxu1 %v5884_v40  ;;  %v5970_v39 = vld [vmem:[#allocation5 + $0xdc8] ss:$16 sps:$4 sm:$0xff]   ;;  %v5971_v40 = vld [vmem:[#allocation5 + $0xde4] ss:$16 sps:$4 sm:$0xff]  }
 0x1b7   :  { %2409 = vmatmul.mubr.f32.vlgmr.msra.gmra.mrb[0].mxu0 %v6408_v22  ;;  %3119 = vmatmul.mubr.f32.vlgmr.msra.gmra.mrb[0].mxu1 %v6408_v22  ;;  %v5901_v22 = vld [vmem:[#allocation5 + $0xc60] ss:$16 sps:$4 sm:$0xff]  }
 0x1b8   :  { %3841 = vmatpush1.bf16.msra.mxu0 %v5883_v41  ;;  %4441 = vmatpush1.bf16.msra.mxu1 %v5886_v43  ;;  %v5974_v41 = vld [vmem:[#allocation5 + $0xdec] ss:$16 sps:$4 sm:$0xff]   ;;  %v1935_v43 = vcombine.high %v6414_v36, %v6414_v36 }
 0x1b9   :  { %3843 = vmatprep.subr.bf16.mxu0 %v5887_v25  ;;  %4443 = vmatprep.subr.bf16.mxu1 %v5890_v44  ;;  %v5973_v25 = vld [vmem:[#allocation5 + $0xde0] ss:$16 sps:$4 sm:$0xff]   ;;  %v5976_v44 = vld [vmem:[#allocation5 + $0xde8] ss:$16 sps:$4 sm:$0xff]  }
 0x1ba   :  { %2479 = vmatprep.mubr.f32.mxu0 %v1950_v45  ;;  %3189 = vmatprep.mubr.f32.mxu1 %v1950_v45  ;;  %v5977_v45 = vld [vmem:[#allocation5 + $0xe04] ss:$16 sps:$4 sm:$0xff]  }
 0x1bc   :  { %3845 = vmatpush1.bf16.msra.mxu0 %v5889_v46  ;;  %4445 = vmatpush1.bf16.msra.mxu1 %v5892_v47  ;;  %v5980_v46 = vld [vmem:[#allocation5 + $0xe0c] ss:$16 sps:$4 sm:$0xff]   ;;  %v6427_v47 = vrot.slane %v1935_v43, %v6368_v49 }
 0x1bd   :  { %3847 = vmatprep.subr.bf16.mxu0 %v5893_v48  ;;  %4447 = vmatprep.subr.bf16.mxu1 %v5896_v12  ;;  %v5979_v48 = vld [vmem:[#allocation5 + $0xe00] ss:$16 sps:$4 sm:$0xff]   ;;  %v5982_v12 = vld [vmem:[#allocation5 + $0xe08] ss:$16 sps:$4 sm:$0xff]   ;;  %v6064_v43 = vld [vmem:[#allocation5 + $0xfcc] ss:$16 sps:$4 sm:$0xff]  }
 0x1be   :  { %v1951_v36 = vcombine.high %v6427_v47, %v6427_v47 }
 0x1c0   :  { %3849 = vmatpush1.bf16.msra.mxu0 %v5895_v50  ;;  %4449 = vmatpush1.bf16.msra.mxu1 %v5898_v51  ;;  %v5983_v50 = vld [vmem:[#allocation5 + $0xe24] ss:$16 sps:$4 sm:$0xff]   ;;  %v5986_v51 = vld [vmem:[#allocation5 + $0xe2c] ss:$16 sps:$4 sm:$0xff]  }
 0x1c1   :  { %3851 = vmatprep.subr.bf16.mxu0 %v5899_v52  ;;  %4451 = vmatprep.subr.bf16.mxu1 %v5902_v53  ;;  %v5985_v52 = vld [vmem:[#allocation5 + $0xe20] ss:$16 sps:$4 sm:$0xff]   ;;  %v5988_v53 = vld [vmem:[#allocation5 + $0xe28] ss:$16 sps:$4 sm:$0xff]  }
 0x1c4   :  { %3853 = vmatpush1.bf16.msra.mxu0 %v5901_v22  ;;  %4453 = vmatpush1.bf16.msra.mxu1 %v5904_v54  ;;  %v5989_v22 = vld [vmem:[#allocation5 + $0xe44] ss:$16 sps:$4 sm:$0xff]   ;;  %v5992_v54 = vld [vmem:[#allocation5 + $0xe4c] ss:$16 sps:$4 sm:$0xff]  }
 0x1c5   :  { %3855 = vmatprep.subr.bf16.mxu0 %v5905_v55  ;;  %4455 = vmatprep.subr.bf16.mxu1 %v5908_v56  ;;  %v5991_v55 = vld [vmem:[#allocation5 + $0xe40] ss:$16 sps:$4 sm:$0xff]   ;;  %v5994_v56 = vld [vmem:[#allocation5 + $0xe48] ss:$16 sps:$4 sm:$0xff]  }
 0x1c8   :  { %3857 = vmatpush1.bf16.msra.mxu0 %v5907_v57  ;;  %4457 = vmatpush1.bf16.msra.mxu1 %v5910_v58  ;;  %v5995_v57 = vld [vmem:[#allocation5 + $0xe64] ss:$16 sps:$4 sm:$0xff]   ;;  %v5998_v58 = vld [vmem:[#allocation5 + $0xe6c] ss:$16 sps:$4 sm:$0xff]  }
 0x1c9   :  { %3859 = vmatprep.subr.bf16.mxu0 %v5911_v59  ;;  %4459 = vmatprep.subr.bf16.mxu1 %v5914_v60  ;;  %v6000_v59 = vld [vmem:[#allocation5 + $0xe68] ss:$16 sps:$4 sm:$0xff]   ;;  %v6001_v60 = vld [vmem:[#allocation5 + $0xe84] ss:$16 sps:$4 sm:$0xff]  }
 0x1cc   :  { %3861 = vmatpush1.bf16.msra.mxu0 %v5913_v61  ;;  %4461 = vmatpush1.bf16.msra.mxu1 %v5916_v62  ;;  %v6004_v61 = vld [vmem:[#allocation5 + $0xe8c] ss:$16 sps:$4 sm:$0xff]   ;;  %v6003_v62 = vld [vmem:[#allocation5 + $0xe80] ss:$16 sps:$4 sm:$0xff]  }
 0x1cd   :  { %3863 = vmatprep.subr.bf16.mxu0 %v5917_v63  ;;  %4463 = vmatprep.subr.bf16.mxu1 %v5920_v0  ;;  %v6006_v63 = vld [vmem:[#allocation5 + $0xe88] ss:$16 sps:$4 sm:$0xff]   ;;  %v6007_v0 = vld [vmem:[#allocation5 + $0xea4] ss:$16 sps:$4 sm:$0xff]  }
 0x1d0   :  { %3865 = vmatpush1.bf16.msra.mxu0 %v5919_v1  ;;  %4465 = vmatpush1.bf16.msra.mxu1 %v5922_v2  ;;  %v6010_v1 = vld [vmem:[#allocation5 + $0xeac] ss:$16 sps:$4 sm:$0xff]   ;;  %v6009_v2 = vld [vmem:[#allocation5 + $0xea0] ss:$16 sps:$4 sm:$0xff]  }
 0x1d1   :  { %3867 = vmatprep.subr.bf16.mxu0 %v5923_v3  ;;  %4467 = vmatprep.subr.bf16.mxu1 %v5926_v4  ;;  %v6012_v3 = vld [vmem:[#allocation5 + $0xea8] ss:$16 sps:$4 sm:$0xff]   ;;  %v6013_v4 = vld [vmem:[#allocation5 + $0xec4] ss:$16 sps:$4 sm:$0xff]  }
 0x1d4   :  { %3869 = vmatpush1.bf16.msra.mxu0 %v5925_v5  ;;  %4469 = vmatpush1.bf16.msra.mxu1 %v5928_v6  ;;  %v6016_v5 = vld [vmem:[#allocation5 + $0xecc] ss:$16 sps:$4 sm:$0xff]   ;;  %v6015_v6 = vld [vmem:[#allocation5 + $0xec0] ss:$16 sps:$4 sm:$0xff]  }
 0x1d5   :  { %3871 = vmatprep.subr.bf16.mxu0 %v5929_v7  ;;  %4471 = vmatprep.subr.bf16.mxu1 %v5932_v8  ;;  %v6018_v7 = vld [vmem:[#allocation5 + $0xec8] ss:$16 sps:$4 sm:$0xff]   ;;  %v6019_v8 = vld [vmem:[#allocation5 + $0xee4] ss:$16 sps:$4 sm:$0xff]  }
 0x1d8   :  { %3873 = vmatpush1.bf16.msra.mxu0 %v5931_v9  ;;  %4473 = vmatpush1.bf16.msra.mxu1 %v5934_v10  ;;  %v6022_v9 = vld [vmem:[#allocation5 + $0xeec] ss:$16 sps:$4 sm:$0xff]   ;;  %v6021_v10 = vld [vmem:[#allocation5 + $0xee0] ss:$16 sps:$4 sm:$0xff]  }
 0x1d9   :  { %3875 = vmatprep.subr.bf16.mxu0 %v5935_v11  ;;  %4475 = vmatprep.subr.bf16.mxu1 %v5938_v13  ;;  %v6024_v11 = vld [vmem:[#allocation5 + $0xee8] ss:$16 sps:$4 sm:$0xff]   ;;  %v6025_v13 = vld [vmem:[#allocation5 + $0xf04] ss:$16 sps:$4 sm:$0xff]  }
 0x1dc   :  { %3877 = vmatpush1.bf16.msra.mxu0 %v5937_v14  ;;  %4477 = vmatpush1.bf16.msra.mxu1 %v5940_v15  ;;  %v6028_v14 = vld [vmem:[#allocation5 + $0xf0c] ss:$16 sps:$4 sm:$0xff]   ;;  %v6027_v15 = vld [vmem:[#allocation5 + $0xf00] ss:$16 sps:$4 sm:$0xff]  }
 0x1dd   :  { %3879 = vmatprep.subr.bf16.mxu0 %v5941_v16  ;;  %4479 = vmatprep.subr.bf16.mxu1 %v5944_v17  ;;  %v6030_v16 = vld [vmem:[#allocation5 + $0xf08] ss:$16 sps:$4 sm:$0xff]   ;;  %v6031_v17 = vld [vmem:[#allocation5 + $0xf24] ss:$16 sps:$4 sm:$0xff]  }
 0x1e0   :  { %3881 = vmatpush1.bf16.msra.mxu0 %v5943_v18  ;;  %4481 = vmatpush1.bf16.msra.mxu1 %v5946_v20  ;;  %v6034_v18 = vld [vmem:[#allocation5 + $0xf2c] ss:$16 sps:$4 sm:$0xff]   ;;  %v6033_v20 = vld [vmem:[#allocation5 + $0xf20] ss:$16 sps:$4 sm:$0xff]  }
 0x1e1   :  { %3883 = vmatprep.subr.bf16.mxu0 %v5947_v21  ;;  %4483 = vmatprep.subr.bf16.mxu1 %v5950_v23  ;;  %v6036_v21 = vld [vmem:[#allocation5 + $0xf28] ss:$16 sps:$4 sm:$0xff]   ;;  %v6037_v23 = vld [vmem:[#allocation5 + $0xf44] ss:$16 sps:$4 sm:$0xff]  }
 0x1e4   :  { %3885 = vmatpush1.bf16.msra.mxu0 %v5949_v24  ;;  %4485 = vmatpush1.bf16.msra.mxu1 %v5952_v26  ;;  %v6040_v24 = vld [vmem:[#allocation5 + $0xf4c] ss:$16 sps:$4 sm:$0xff]   ;;  %v6039_v26 = vld [vmem:[#allocation5 + $0xf40] ss:$16 sps:$4 sm:$0xff]  }
 0x1e5   :  { %3887 = vmatprep.subr.bf16.mxu0 %v5953_v28  ;;  %4487 = vmatprep.subr.bf16.mxu1 %v5956_v29  ;;  %v6042_v28 = vld [vmem:[#allocation5 + $0xf48] ss:$16 sps:$4 sm:$0xff]   ;;  %v6043_v29 = vld [vmem:[#allocation5 + $0xf64] ss:$16 sps:$4 sm:$0xff]  }
 0x1e8   :  { %3889 = vmatpush1.bf16.msra.mxu0 %v5955_v19  ;;  %4489 = vmatpush1.bf16.msra.mxu1 %v5958_v30  ;;  %v6046_v19 = vld [vmem:[#allocation5 + $0xf6c] ss:$16 sps:$4 sm:$0xff]   ;;  %v6045_v30 = vld [vmem:[#allocation5 + $0xf60] ss:$16 sps:$4 sm:$0xff]  }
 0x1e9   :  { %3891 = vmatprep.subr.bf16.mxu0 %v5959_v31  ;;  %4491 = vmatprep.subr.bf16.mxu1 %v5962_v32  ;;  %v6048_v31 = vld [vmem:[#allocation5 + $0xf68] ss:$16 sps:$4 sm:$0xff]   ;;  %v6049_v32 = vld [vmem:[#allocation5 + $0xf84] ss:$16 sps:$4 sm:$0xff]  }
 0x1ec   :  { %3893 = vmatpush1.bf16.msra.mxu0 %v5961_v33  ;;  %4493 = vmatpush1.bf16.msra.mxu1 %v5964_v34  ;;  %v6052_v33 = vld [vmem:[#allocation5 + $0xf8c] ss:$16 sps:$4 sm:$0xff]   ;;  %v6051_v34 = vld [vmem:[#allocation5 + $0xf80] ss:$16 sps:$4 sm:$0xff]  }
 0x1ed   :  { %3895 = vmatprep.subr.bf16.mxu0 %v5965_v35  ;;  %4495 = vmatprep.subr.bf16.mxu1 %v5968_v37  ;;  %v6054_v35 = vld [vmem:[#allocation5 + $0xf88] ss:$16 sps:$4 sm:$0xff]   ;;  %v6055_v37 = vld [vmem:[#allocation5 + $0xfa4] ss:$16 sps:$4 sm:$0xff]  }
 0x1f0   :  { %3897 = vmatpush1.bf16.msra.mxu0 %v5967_v38  ;;  %4497 = vmatpush1.bf16.msra.mxu1 %v5970_v39  ;;  %v6058_v38 = vld [vmem:[#allocation5 + $0xfac] ss:$16 sps:$4 sm:$0xff]   ;;  %v6057_v39 = vld [vmem:[#allocation5 + $0xfa0] ss:$16 sps:$4 sm:$0xff]  }
 0x1f1   :  { %3899 = vmatprep.subr.bf16.mxu0 %v5971_v40  ;;  %4499 = vmatprep.subr.bf16.mxu1 %v5974_v41  ;;  %v6060_v40 = vld [vmem:[#allocation5 + $0xfa8] ss:$16 sps:$4 sm:$0xff]   ;;  %v6061_v41 = vld [vmem:[#allocation5 + $0xfc4] ss:$16 sps:$4 sm:$0xff]  }
 0x1f4   :  { %3901 = vmatpush1.bf16.msra.mxu0 %v5973_v25  ;;  %4501 = vmatpush1.bf16.msra.mxu1 %v5976_v44  ;;  %v6063_v25 = vld [vmem:[#allocation5 + $0xfc0] ss:$16 sps:$4 sm:$0xff]   ;;  %v6066_v44 = vld [vmem:[#allocation5 + $0xfc8] ss:$16 sps:$4 sm:$0xff]  }
 0x1f5   :  { %3903 = vmatprep.subr.bf16.mxu0 %v5977_v45  ;;  %4503 = vmatprep.subr.bf16.mxu1 %v5980_v46  ;;  %v6067_v45 = vld [vmem:[#allocation5 + $0xfe4] ss:$16 sps:$4 sm:$0xff]   ;;  %v6070_v46 = vld [vmem:[#allocation5 + $0xfec] ss:$16 sps:$4 sm:$0xff]  }
 0x1f7   :  { %2480 = vmatmul.mubr.f32.vlgmr.msra.gmra.mrb[0].mxu0 %v6418_v27  ;;  %3190 = vmatmul.mubr.f32.vlgmr.msra.gmra.mrb[0].mxu1 %v6418_v27  ;;  %v5997_v27 = vld [vmem:[#allocation5 + $0xe60] ss:$16 sps:$4 sm:$0xff]  }
 0x1f8   :  { %3905 = vmatpush1.bf16.msra.mxu0 %v5979_v48  ;;  %4505 = vmatpush1.bf16.msra.mxu1 %v5982_v12  ;;  %v6433_v48 = vld [vmem:[#allocation2 + $0x20] sm:$0x3f]  ;;  %v6069_v12 = vld [vmem:[#allocation5 + $0xfe0] ss:$16 sps:$4 sm:$0xff]  }
 0x1f9   :  { %3907 = vmatprep.subr.bf16.mxu0 %v5983_v50  ;;  %4507 = vmatprep.subr.bf16.mxu1 %v5986_v51  ;;  %v6072_v50 = vld [vmem:[#allocation5 + $0xfe8] ss:$16 sps:$4 sm:$0xff]   ;;  %v6074_v51 = vld [vmem:[#allocation5 + $0x1004] ss:$16 sps:$4 sm:$0xff]  }
 0x1fa   :  { %2550 = vmatprep.mubr.f32.mxu0 %v1951_v36  ;;  %3260 = vmatprep.mubr.f32.mxu1 %v1951_v36  ;;  %v6077_v36 = vld [vmem:[#allocation5 + $0x100c] ss:$16 sps:$4 sm:$0xff]  }
 0x1fc   :  { %3909 = vmatpush1.bf16.msra.mxu0 %v5985_v52  ;;  %4509 = vmatpush1.bf16.msra.mxu1 %v5988_v53  ;;  %v6437_v52 = vrot.slane %v6433_v48, %v6368_v49  ;;  %v6076_v53 = vld [vmem:[#allocation5 + $0x1000] ss:$16 sps:$4 sm:$0xff]  }
 0x1fd   :  { %3911 = vmatprep.subr.bf16.mxu0 %v5989_v22  ;;  %4511 = vmatprep.subr.bf16.mxu1 %v5992_v54  ;;  %v6079_v22 = vld [vmem:[#allocation5 + $0x1008] ss:$16 sps:$4 sm:$0xff]   ;;  %v6080_v54 = vld [vmem:[#allocation5 + $0x1024] ss:$16 sps:$4 sm:$0xff]  }
 0x200   :  { %3913 = vmatpush1.bf16.msra.mxu0 %v5991_v55  ;;  %4513 = vmatpush1.bf16.msra.mxu1 %v5994_v56  ;;  %v6083_v55 = vld [vmem:[#allocation5 + $0x102c] ss:$16 sps:$4 sm:$0xff]   ;;  %v1967_v56 = vcombine.high %v6437_v52, %v6437_v52 }
 0x201   :  { %3915 = vmatprep.subr.bf16.mxu0 %v5995_v57  ;;  %4515 = vmatprep.subr.bf16.mxu1 %v5998_v58  ;;  %v6082_v57 = vld [vmem:[#allocation5 + $0x1020] ss:$16 sps:$4 sm:$0xff]   ;;  %v6085_v58 = vld [vmem:[#allocation5 + $0x1028] ss:$16 sps:$4 sm:$0xff]  }
 0x204   :  { %3917 = vmatpush1.bf16.msra.mxu0 %v5997_v27  ;;  %4517 = vmatpush1.bf16.msra.mxu1 %v6000_v59  ;;  %v6086_v27 = vld [vmem:[#allocation5 + $0x1044] ss:$16 sps:$4 sm:$0xff]   ;;  %v6089_v59 = vld [vmem:[#allocation5 + $0x104c] ss:$16 sps:$4 sm:$0xff]  }
 0x205   :  { %3919 = vmatprep.subr.bf16.mxu0 %v6001_v60  ;;  %4519 = vmatprep.subr.bf16.mxu1 %v6004_v61  ;;  %v6088_v60 = vld [vmem:[#allocation5 + $0x1040] ss:$16 sps:$4 sm:$0xff]   ;;  %v6091_v61 = vld [vmem:[#allocation5 + $0x1048] ss:$16 sps:$4 sm:$0xff]  }
 0x208   :  { %3921 = vmatpush1.bf16.msra.mxu0 %v6003_v62  ;;  %4521 = vmatpush1.bf16.msra.mxu1 %v6006_v63  ;;  %v6092_v62 = vld [vmem:[#allocation5 + $0x1064] ss:$16 sps:$4 sm:$0xff]   ;;  %v6095_v63 = vld [vmem:[#allocation5 + $0x106c] ss:$16 sps:$4 sm:$0xff]  }
 0x209   :  { %3923 = vmatprep.subr.bf16.mxu0 %v6007_v0  ;;  %4523 = vmatprep.subr.bf16.mxu1 %v6010_v1  ;;  %v6097_v0 = vld [vmem:[#allocation5 + $0x1068] ss:$16 sps:$4 sm:$0xff]   ;;  %v6098_v1 = vld [vmem:[#allocation5 + $0x1084] ss:$16 sps:$4 sm:$0xff]  }
 0x20c   :  { %3925 = vmatpush1.bf16.msra.mxu0 %v6009_v2  ;;  %4525 = vmatpush1.bf16.msra.mxu1 %v6012_v3  ;;  %v6101_v2 = vld [vmem:[#allocation5 + $0x108c] ss:$16 sps:$4 sm:$0xff]   ;;  %v6100_v3 = vld [vmem:[#allocation5 + $0x1080] ss:$16 sps:$4 sm:$0xff]  }
 0x20d   :  { %3927 = vmatprep.subr.bf16.mxu0 %v6013_v4  ;;  %4527 = vmatprep.subr.bf16.mxu1 %v6016_v5  ;;  %v6103_v4 = vld [vmem:[#allocation5 + $0x1088] ss:$16 sps:$4 sm:$0xff]   ;;  %v6104_v5 = vld [vmem:[#allocation5 + $0x10a4] ss:$16 sps:$4 sm:$0xff]  }
 0x210   :  { %3929 = vmatpush1.bf16.msra.mxu0 %v6015_v6  ;;  %4529 = vmatpush1.bf16.msra.mxu1 %v6018_v7  ;;  %v6107_v6 = vld [vmem:[#allocation5 + $0x10ac] ss:$16 sps:$4 sm:$0xff]   ;;  %v6106_v7 = vld [vmem:[#allocation5 + $0x10a0] ss:$16 sps:$4 sm:$0xff]  }
 0x211   :  { %3931 = vmatprep.subr.bf16.mxu0 %v6019_v8  ;;  %4531 = vmatprep.subr.bf16.mxu1 %v6022_v9  ;;  %v6109_v8 = vld [vmem:[#allocation5 + $0x10a8] ss:$16 sps:$4 sm:$0xff]   ;;  %v6110_v9 = vld [vmem:[#allocation5 + $0x10c4] ss:$16 sps:$4 sm:$0xff]  }
 0x214   :  { %3933 = vmatpush1.bf16.msra.mxu0 %v6021_v10  ;;  %4533 = vmatpush1.bf16.msra.mxu1 %v6024_v11  ;;  %v6113_v10 = vld [vmem:[#allocation5 + $0x10cc] ss:$16 sps:$4 sm:$0xff]   ;;  %v6112_v11 = vld [vmem:[#allocation5 + $0x10c0] ss:$16 sps:$4 sm:$0xff]  }
 0x215   :  { %3935 = vmatprep.subr.bf16.mxu0 %v6025_v13  ;;  %4535 = vmatprep.subr.bf16.mxu1 %v6028_v14  ;;  %v6115_v13 = vld [vmem:[#allocation5 + $0x10c8] ss:$16 sps:$4 sm:$0xff]   ;;  %v6116_v14 = vld [vmem:[#allocation5 + $0x10e4] ss:$16 sps:$4 sm:$0xff]  }
 0x218   :  { %3937 = vmatpush1.bf16.msra.mxu0 %v6027_v15  ;;  %4537 = vmatpush1.bf16.msra.mxu1 %v6030_v16  ;;  %v6119_v15 = vld [vmem:[#allocation5 + $0x10ec] ss:$16 sps:$4 sm:$0xff]   ;;  %v6118_v16 = vld [vmem:[#allocation5 + $0x10e0] ss:$16 sps:$4 sm:$0xff]  }
 0x219   :  { %3939 = vmatprep.subr.bf16.mxu0 %v6031_v17  ;;  %4539 = vmatprep.subr.bf16.mxu1 %v6034_v18  ;;  %v6121_v17 = vld [vmem:[#allocation5 + $0x10e8] ss:$16 sps:$4 sm:$0xff]   ;;  %v6122_v18 = vld [vmem:[#allocation5 + $0x1104] ss:$16 sps:$4 sm:$0xff]  }
 0x21c   :  { %3941 = vmatpush1.bf16.msra.mxu0 %v6033_v20  ;;  %4541 = vmatpush1.bf16.msra.mxu1 %v6036_v21  ;;  %v6125_v20 = vld [vmem:[#allocation5 + $0x110c] ss:$16 sps:$4 sm:$0xff]   ;;  %v6124_v21 = vld [vmem:[#allocation5 + $0x1100] ss:$16 sps:$4 sm:$0xff]  }
 0x21d   :  { %3943 = vmatprep.subr.bf16.mxu0 %v6037_v23  ;;  %4543 = vmatprep.subr.bf16.mxu1 %v6040_v24  ;;  %v6127_v23 = vld [vmem:[#allocation5 + $0x1108] ss:$16 sps:$4 sm:$0xff]   ;;  %v6128_v24 = vld [vmem:[#allocation5 + $0x1124] ss:$16 sps:$4 sm:$0xff]  }
 0x220   :  { %3945 = vmatpush1.bf16.msra.mxu0 %v6039_v26  ;;  %4545 = vmatpush1.bf16.msra.mxu1 %v6042_v28  ;;  %v6131_v26 = vld [vmem:[#allocation5 + $0x112c] ss:$16 sps:$4 sm:$0xff]   ;;  %v6130_v28 = vld [vmem:[#allocation5 + $0x1120] ss:$16 sps:$4 sm:$0xff]  }
 0x221   :  { %3947 = vmatprep.subr.bf16.mxu0 %v6043_v29  ;;  %4547 = vmatprep.subr.bf16.mxu1 %v6046_v19  ;;  %v6133_v29 = vld [vmem:[#allocation5 + $0x1128] ss:$16 sps:$4 sm:$0xff]   ;;  %v6134_v19 = vld [vmem:[#allocation5 + $0x1144] ss:$16 sps:$4 sm:$0xff]  }
 0x224   :  { %3949 = vmatpush1.bf16.msra.mxu0 %v6045_v30  ;;  %4549 = vmatpush1.bf16.msra.mxu1 %v6048_v31  ;;  %v6137_v30 = vld [vmem:[#allocation5 + $0x114c] ss:$16 sps:$4 sm:$0xff]   ;;  %v6136_v31 = vld [vmem:[#allocation5 + $0x1140] ss:$16 sps:$4 sm:$0xff]  }
 0x225   :  { %3951 = vmatprep.subr.bf16.mxu0 %v6049_v32  ;;  %4551 = vmatprep.subr.bf16.mxu1 %v6052_v33  ;;  %v6139_v32 = vld [vmem:[#allocation5 + $0x1148] ss:$16 sps:$4 sm:$0xff]   ;;  %v6140_v33 = vld [vmem:[#allocation5 + $0x1164] ss:$16 sps:$4 sm:$0xff]  }
 0x228   :  { %3953 = vmatpush1.bf16.msra.mxu0 %v6051_v34  ;;  %4553 = vmatpush1.bf16.msra.mxu1 %v6054_v35  ;;  %v6143_v34 = vld [vmem:[#allocation5 + $0x116c] ss:$16 sps:$4 sm:$0xff]   ;;  %v6142_v35 = vld [vmem:[#allocation5 + $0x1160] ss:$16 sps:$4 sm:$0xff]  }
 0x229   :  { %3955 = vmatprep.subr.bf16.mxu0 %v6055_v37  ;;  %4555 = vmatprep.subr.bf16.mxu1 %v6058_v38  ;;  %v6145_v37 = vld [vmem:[#allocation5 + $0x1168] ss:$16 sps:$4 sm:$0xff]   ;;  %v6146_v38 = vld [vmem:[#allocation5 + $0x1184] ss:$16 sps:$4 sm:$0xff]  }
 0x22c   :  { %3957 = vmatpush1.bf16.msra.mxu0 %v6057_v39  ;;  %4557 = vmatpush1.bf16.msra.mxu1 %v6060_v40  ;;  %v6149_v39 = vld [vmem:[#allocation5 + $0x118c] ss:$16 sps:$4 sm:$0xff]   ;;  %v6148_v40 = vld [vmem:[#allocation5 + $0x1180] ss:$16 sps:$4 sm:$0xff]  }
 0x22d   :  { %3959 = vmatprep.subr.bf16.mxu0 %v6061_v41  ;;  %4559 = vmatprep.subr.bf16.mxu1 %v6064_v43  ;;  %v6151_v41 = vld [vmem:[#allocation5 + $0x1188] ss:$16 sps:$4 sm:$0xff]   ;;  %v6152_v43 = vld [vmem:[#allocation5 + $0x11a4] ss:$16 sps:$4 sm:$0xff]  }
 0x230   :  { %3961 = vmatpush1.bf16.msra.mxu0 %v6063_v25  ;;  %4561 = vmatpush1.bf16.msra.mxu1 %v6066_v44  ;;  %v6155_v25 = vld [vmem:[#allocation5 + $0x11ac] ss:$16 sps:$4 sm:$0xff]   ;;  %v6154_v44 = vld [vmem:[#allocation5 + $0x11a0] ss:$16 sps:$4 sm:$0xff]  }
 0x231   :  { %3963 = vmatprep.subr.bf16.mxu0 %v6067_v45  ;;  %4563 = vmatprep.subr.bf16.mxu1 %v6070_v46  ;;  %v6157_v45 = vld [vmem:[#allocation5 + $0x11a8] ss:$16 sps:$4 sm:$0xff]   ;;  %v6158_v46 = vld [vmem:[#allocation5 + $0x11c4] ss:$16 sps:$4 sm:$0xff]  }
 0x234   :  { %3965 = vmatpush1.bf16.msra.mxu0 %v6069_v12  ;;  %4565 = vmatpush1.bf16.msra.mxu1 %v6072_v50  ;;  %v6161_v12 = vld [vmem:[#allocation5 + $0x11cc] ss:$16 sps:$4 sm:$0xff]   ;;  %v6160_v50 = vld [vmem:[#allocation5 + $0x11c0] ss:$16 sps:$4 sm:$0xff]  }
 0x235   :  { %3967 = vmatprep.subr.bf16.mxu0 %v6074_v51  ;;  %4567 = vmatprep.subr.bf16.mxu1 %v6077_v36  ;;  %v6163_v51 = vld [vmem:[#allocation5 + $0x11c8] ss:$16 sps:$4 sm:$0xff]   ;;  %v6164_v36 = vld [vmem:[#allocation5 + $0x11e4] ss:$16 sps:$4 sm:$0xff]  }
 0x237   :  { %2551 = vmatmul.mubr.f32.vlgmr.msra.gmra.mrb[0].mxu0 %v6427_v47  ;;  %3261 = vmatmul.mubr.f32.vlgmr.msra.gmra.mrb[0].mxu1 %v6427_v47  ;;  %v6094_v47 = vld [vmem:[#allocation5 + $0x1060] ss:$16 sps:$4 sm:$0xff]  }
 0x238   :  { %3969 = vmatpush1.bf16.msra.mxu0 %v6076_v53  ;;  %4569 = vmatpush1.bf16.msra.mxu1 %v6079_v22  ;;  %v6167_v53 = vld [vmem:[#allocation5 + $0x11ec] ss:$16 sps:$4 sm:$0xff]   ;;  %v6166_v22 = vld [vmem:[#allocation5 + $0x11e0] ss:$16 sps:$4 sm:$0xff]  }
 0x239   :  { %3971 = vmatprep.subr.bf16.mxu0 %v6080_v54  ;;  %4571 = vmatprep.subr.bf16.mxu1 %v6083_v55  ;;  %v6169_v54 = vld [vmem:[#allocation5 + $0x11e8] ss:$16 sps:$4 sm:$0xff]   ;;  %v6171_v55 = vld [vmem:[#allocation5 + $0x1204] ss:$16 sps:$4 sm:$0xff]  }
 0x23a   :  { %2621 = vmatprep.mubr.f32.mxu0 %v1967_v56  ;;  %3331 = vmatprep.mubr.f32.mxu1 %v1967_v56  ;;  %v6174_v56 = vld [vmem:[#allocation5 + $0x120c] ss:$16 sps:$4 sm:$0xff]  }
 0x23c   :  { %3973 = vmatpush1.bf16.msra.mxu0 %v6082_v57  ;;  %4573 = vmatpush1.bf16.msra.mxu1 %v6085_v58  ;;  %v6173_v57 = vld [vmem:[#allocation5 + $0x1200] ss:$16 sps:$4 sm:$0xff]   ;;  %v6176_v58 = vld [vmem:[#allocation5 + $0x1208] ss:$16 sps:$4 sm:$0xff]  }
 0x23d   :  { %3975 = vmatprep.subr.bf16.mxu0 %v6086_v27  ;;  %4575 = vmatprep.subr.bf16.mxu1 %v6089_v59  ;;  %v6177_v27 = vld [vmem:[#allocation5 + $0x1224] ss:$16 sps:$4 sm:$0xff]   ;;  %v6180_v59 = vld [vmem:[#allocation5 + $0x122c] ss:$16 sps:$4 sm:$0xff]  }
 0x240   :  { %3977 = vmatpush1.bf16.msra.mxu0 %v6088_v60  ;;  %4577 = vmatpush1.bf16.msra.mxu1 %v6091_v61  ;;  %v6179_v60 = vld [vmem:[#allocation5 + $0x1220] ss:$16 sps:$4 sm:$0xff]   ;;  %v6182_v61 = vld [vmem:[#allocation5 + $0x1228] ss:$16 sps:$4 sm:$0xff]  }
 0x241   :  { %3979 = vmatprep.subr.bf16.mxu0 %v6092_v62  ;;  %4579 = vmatprep.subr.bf16.mxu1 %v6095_v63  ;;  %v6183_v62 = vld [vmem:[#allocation5 + $0x1244] ss:$16 sps:$4 sm:$0xff]   ;;  %v6186_v63 = vld [vmem:[#allocation5 + $0x124c] ss:$16 sps:$4 sm:$0xff]  }
 0x244   :  { %3981 = vmatpush1.bf16.msra.mxu0 %v6094_v47  ;;  %4581 = vmatpush1.bf16.msra.mxu1 %v6097_v0  ;;  %v6307_v47 = vmov 0.0   ;;  %v6185_v0 = vld [vmem:[#allocation5 + $0x1240] ss:$16 sps:$4 sm:$0xff]  }
 0x245   :  { %3983 = vmatprep.subr.bf16.mxu0 %v6098_v1  ;;  %4583 = vmatprep.subr.bf16.mxu1 %v6101_v2  ;;  %v6188_v1 = vld [vmem:[#allocation5 + $0x1248] ss:$16 sps:$4 sm:$0xff]   ;;  %v6189_v2 = vld [vmem:[#allocation5 + $0x1264] ss:$16 sps:$4 sm:$0xff]  }
 0x248   :  { %3985 = vmatpush1.bf16.msra.mxu0 %v6100_v3  ;;  %4585 = vmatpush1.bf16.msra.mxu1 %v6103_v4  ;;  %v6192_v3 = vld [vmem:[#allocation5 + $0x126c] ss:$16 sps:$4 sm:$0xff]   ;;  %v6194_v4 = vld [vmem:[#allocation5 + $0x1268] ss:$16 sps:$4 sm:$0xff]  }
 0x249   :  { %3987 = vmatprep.subr.bf16.mxu0 %v6104_v5  ;;  %4587 = vmatprep.subr.bf16.mxu1 %v6107_v6  ;;  %v6195_v5 = vld [vmem:[#allocation5 + $0x1284] ss:$16 sps:$4 sm:$0xff]   ;;  %v6198_v6 = vld [vmem:[#allocation5 + $0x128c] ss:$16 sps:$4 sm:$0xff]  }
 0x24c   :  { %3989 = vmatpush1.bf16.msra.mxu0 %v6106_v7  ;;  %4589 = vmatpush1.bf16.msra.mxu1 %v6109_v8  ;;  %v6197_v7 = vld [vmem:[#allocation5 + $0x1280] ss:$16 sps:$4 sm:$0xff]   ;;  %v6200_v8 = vld [vmem:[#allocation5 + $0x1288] ss:$16 sps:$4 sm:$0xff]  }
 0x24d   :  { %3991 = vmatprep.subr.bf16.mxu0 %v6110_v9  ;;  %4591 = vmatprep.subr.bf16.mxu1 %v6113_v10  ;;  %v6201_v9 = vld [vmem:[#allocation5 + $0x12a4] ss:$16 sps:$4 sm:$0xff]   ;;  %v6204_v10 = vld [vmem:[#allocation5 + $0x12ac] ss:$16 sps:$4 sm:$0xff]  }
 0x250   :  { %3993 = vmatpush1.bf16.msra.mxu0 %v6112_v11  ;;  %4593 = vmatpush1.bf16.msra.mxu1 %v6115_v13  ;;  %v1952_v11 = vcombine.high %v6433_v48, %v6433_v48  ;;  %v6203_v13 = vld [vmem:[#allocation5 + $0x12a0] ss:$16 sps:$4 sm:$0xff]   ;;  %v1865_v48 = vsub.s32 1, %v6365_v42 }
 0x251   :  { %3995 = vmatprep.subr.bf16.mxu0 %v6116_v14  ;;  %4595 = vmatprep.subr.bf16.mxu1 %v6119_v15  ;;  %v6206_v14 = vld [vmem:[#allocation5 + $0x12a8] ss:$16 sps:$4 sm:$0xff]  }
 0x252   :  { %v1966_v15 = vrot.slane %v1952_v11, %v6368_v49 }
 0x254   :  { %3997 = vmatpush1.bf16.msra.mxu0 %v6118_v16  ;;  %4597 = vmatpush1.bf16.msra.mxu1 %v6121_v17  ;;  %v1861_v16 = vsub.s32 0, %v6365_v42  ;;  %v1869_v17 = vsub.s32 2, %v6365_v42 }
 0x255   :  { %3999 = vmatprep.subr.bf16.mxu0 %v6122_v18  ;;  %4599 = vmatprep.subr.bf16.mxu1 %v6125_v20  ;;  %v1857_v18 = vld [vmem:[#allocation7] sm:$0xf]  ;;  %v1873_v20 = vsub.s32 3, %v6365_v42 }
 0x258   :  { %4001 = vmatpush1.bf16.msra.mxu0 %v6124_v21  ;;  %4601 = vmatpush1.bf16.msra.mxu1 %v6127_v23  ;;  %v1862_v21 = vrot.slane %v1857_v18, %v1861_v16  ;;  %v1870_v23 = vrot.slane %v1857_v18, %v1869_v17 }
 0x259   :  { %4003 = vmatprep.subr.bf16.mxu0 %v6128_v24  ;;  %4603 = vmatprep.subr.bf16.mxu1 %v6131_v26  ;;  %v1866_v24 = vrot.slane %v1857_v18, %v1865_v48  ;;  %v1874_v26 = vrot.slane %v1857_v18, %v1873_v20 }
 0x25c   :  { %4005 = vmatpush1.bf16.msra.mxu0 %v6130_v28  ;;  %4605 = vmatpush1.bf16.msra.mxu1 %v6133_v29 }
 0x25d   :  { %4007 = vmatprep.subr.bf16.mxu0 %v6134_v19  ;;  %4607 = vmatprep.subr.bf16.mxu1 %v6137_v30 }
 0x260   :  { %4009 = vmatpush1.bf16.msra.mxu0 %v6136_v31  ;;  %4609 = vmatpush1.bf16.msra.mxu1 %v6139_v32 }
 0x261   :  { %4011 = vmatprep.subr.bf16.mxu0 %v6140_v33  ;;  %4611 = vmatprep.subr.bf16.mxu1 %v6143_v34 }
 0x264   :  { %4013 = vmatpush1.bf16.msra.mxu0 %v6142_v35  ;;  %4613 = vmatpush1.bf16.msra.mxu1 %v6145_v37 }
 0x265   :  { %4015 = vmatprep.subr.bf16.mxu0 %v6146_v38  ;;  %4615 = vmatprep.subr.bf16.mxu1 %v6149_v39 }
 0x268   :  { %4017 = vmatpush1.bf16.msra.mxu0 %v6148_v40  ;;  %4617 = vmatpush1.bf16.msra.mxu1 %v6151_v41 }
 0x269   :  { %4019 = vmatprep.subr.bf16.mxu0 %v6152_v43  ;;  %4619 = vmatprep.subr.bf16.mxu1 %v6155_v25 }
 0x26c   :  { %4021 = vmatpush1.bf16.msra.mxu0 %v6154_v44  ;;  %4621 = vmatpush1.bf16.msra.mxu1 %v6157_v45 }
 0x26d   :  { %4023 = vmatprep.subr.bf16.mxu0 %v6158_v46  ;;  %4623 = vmatprep.subr.bf16.mxu1 %v6161_v12 }
 0x270   :  { %4025 = vmatpush1.bf16.msra.mxu0 %v6160_v50  ;;  %4625 = vmatpush1.bf16.msra.mxu1 %v6163_v51 }
 0x271   :  { %4027 = vmatprep.subr.bf16.mxu0 %v6164_v36  ;;  %4627 = vmatprep.subr.bf16.mxu1 %v6167_v53 }
 0x274   :  { %4029 = vmatpush1.bf16.msra.mxu0 %v6166_v22  ;;  %4629 = vmatpush1.bf16.msra.mxu1 %v6169_v54 }
 0x275   :  { %4031 = vmatprep.subr.bf16.mxu0 %v6171_v55  ;;  %4631 = vmatprep.subr.bf16.mxu1 %v6174_v56 }
 0x277   :  { %2622 = vmatmul.mubr.f32.vlgmr.msra.gmra.mrb[0].mxu0 %v6437_v52  ;;  %3332 = vmatmul.mubr.f32.vlgmr.msra.gmra.mrb[0].mxu1 %v6437_v52  ;;  %v6191_v52 = vld [vmem:[#allocation5 + $0x1260] ss:$16 sps:$4 sm:$0xff]  }
 0x278   :  { %4033 = vmatpush1.bf16.msra.mxu0 %v6173_v57  ;;  %4633 = vmatpush1.bf16.msra.mxu1 %v6176_v58 }
 0x279   :  { %4035 = vmatprep.subr.bf16.mxu0 %v6177_v27  ;;  %4635 = vmatprep.subr.bf16.mxu1 %v6180_v59 }
 0x27a   :  { %2692 = vmatprep.mubr.f32.mxu0 %v6307_v47  ;;  %3402 = vmatprep.mubr.f32.mxu1 %v6307_v47 }
 0x27c   :  { %4037 = vmatpush1.bf16.msra.mxu0 %v6179_v60  ;;  %4637 = vmatpush1.bf16.msra.mxu1 %v6182_v61 }
 0x27d   :  { %4039 = vmatprep.subr.bf16.mxu0 %v6183_v62  ;;  %4639 = vmatprep.subr.bf16.mxu1 %v6186_v63 }
 0x280   :  { %4041 = vmatpush1.bf16.msra.mxu0 %v6185_v0  ;;  %4641 = vmatpush1.bf16.msra.mxu1 %v6188_v1 }
 0x281   :  { %4043 = vmatprep.subr.bf16.mxu0 %v6189_v2  ;;  %4643 = vmatprep.subr.bf16.mxu1 %v6192_v3 }
 0x284   :  { %4045 = vmatpush1.bf16.msra.mxu0 %v6191_v52  ;;  %4645 = vmatpush1.bf16.msra.mxu1 %v6194_v4 }
 0x285   :  { %4047 = vmatprep.subr.bf16.mxu0 %v6195_v5  ;;  %4647 = vmatprep.subr.bf16.mxu1 %v6198_v6 }
 0x288   :  { %4049 = vmatpush1.bf16.msra.mxu0 %v6197_v7  ;;  %4649 = vmatpush1.bf16.msra.mxu1 %v6200_v8 }
 0x289   :  { %4051 = vmatprep.subr.bf16.mxu0 %v6201_v9  ;;  %4651 = vmatprep.subr.bf16.mxu1 %v6204_v10 }
 0x28c   :  { %4053 = vmatpush1.bf16.msra.mxu0 %v6203_v13  ;;  %4653 = vmatpush1.bf16.msra.mxu1 %v6206_v14 }
 0x28f   :  { %3452 = vmatmul.mubr.msk.f32.vlgmr.msra.gmra.mrb[0].mxu0 %vm1986_vm0, %v1966_v15  ;;  %3453 = vmatmul.mubr.msk.f32.vlgmr.msra.gmra.mrb[0].mxu1 %vm1986_vm0, %v1966_v15 }
 0x362   :  { %v2694_v28 = vpop.f32.mrb[0].mxu0  ;;  %v3404_v29 = vpop.f32.mrb[0].mxu1 }
 0x363   :  { %v4654_v19 = vadd.f32 %v2694_v28, %v1862_v21  ;;  %v4656_v30 = vadd.f32 %v3404_v29, %v1870_v23  ;;  %v2696_v31 = vpop.f32.mrb[1].mxu0  ;;  %v3406_v32 = vpop.f32.mrb[1].mxu1 }
 0x364   :  { %v4655_v33 = vadd.f32 %v2696_v31, %v1866_v24  ;;  %v4657_v34 = vadd.f32 %v3406_v32, %v1874_v26 }
 0x365   :  { %v3409_v35 = vmax.f32 %v4654_v19, 0.0  ;;  %v3411_v37 = vmax.f32 %v4656_v30, 0.0 }
 0x366   :  { %v3410_v38 = vmax.f32 %v4655_v33, 0.0  ;;  %v3412_v39 = vmax.f32 %v4657_v34, 0.0 }
 0x368   :  { %v3417_v40 = vcombine.low %v3409_v35, %v3410_v38  ;;  %v3418_v41 = vcombine.low %v3411_v37, %v3412_v39 }
 0x36a   :  { %v3425_v42 = vrot.slane %v3417_v40, %v6368_v49  ;;  %v3432_v43 = vrot.slane %v3418_v41, %v6368_v49 }
 0x36c   :  { %v3433_v25 = vcombine.low %v3425_v42, %v3432_v43 }
 0x36e   :  { %3435 = vst [vmem:[#allocation8] sm:$0xff] %v3433_v25 }
 0x36f   :  { %6284 = shalt.err (!%p6281_p0)
}
 0x370   :  { %s6285_s25 = scalar_lea.hbm %s6469_s3, 128 }
 0x371   :  { %p6286_p1 = scmp.ne.s32.totalorder %s6469_s3, %s6285_s25  ;;  %p6289_p2 = scmp.lt.u32.totalorder %s6285_s25, %s6469_s3 }
 0x373   :  { %p6291_p3 = pnand %p6289_p2, %p6286_p1 }
 0x375   :  { %6294 = shalt.err (!%p6291_p3)
}
 0x376   :  { %3445 = dma.vmem_to_hbm [thread:$0]  %s3443_s21, 128, %s6469_s3, [#allocation4]  }
 0x377   :  { %6299 = dma.done.wait [#allocation4], 128  }
 0x378   :  { %6300 = vsyncadd [#allocation4], 4294967168 }
 0x379   :  { %3449 = vsyncpa [#allocation3], 1 }
 0x37a   :  { %3450 = vsyncpa [#allocation6], 1 }
 0x37b   :  { %3451 = vsyncpa [#allocation4], 1 }

</bundles_post_ra>
